<compile_context>
chip_gen: v7x
topology: tpu7x:2x2x1
jax: 0.10.0
libtpu: 0.0.40
codegen_flags: <defaults>
</compile_context>

<pallas_src>
import functools
import math

import jax
import jax.numpy as jnp
from jax.experimental import pallas as pl
from jax.experimental.pallas import tpu as pltpu


# ----------------------------------------------------------------------------- helpers
def _erf(x):
    # Abramowitz & Stegun 7.1.26 rational approximation, |error| <= 1.5e-7.
    # Uses only exp / mul / add / div / where, all of which lower on Mosaic.
    a1, a2, a3, a4, a5 = 0.254829592, -0.284496736, 1.421413741, -1.453152027, 1.061405429
    p = 0.3275911
    ax = jnp.abs(x)
    t = 1.0 / (1.0 + p * ax)
    poly = ((((a5 * t + a4) * t + a3) * t + a2) * t + a1) * t
    y = 1.0 - poly * jnp.exp(-ax * ax)
    return jnp.where(x < 0, -y, y)


def _gelu_exact(x):
    # UER gelu: x * 0.5 * (1 + erf(x / sqrt(2)))
    return x * 0.5 * (1.0 + _erf(x * 0.7071067811865476))


def _layer_norm(x, gamma, beta, eps=1e-6):
    # UER LayerNorm: gamma * (x - mean) / (std + eps) + beta, std unbiased (ddof=1).
    mean = jnp.mean(x, axis=-1, keepdims=True)
    d = x - mean
    var = jnp.sum(d * d, axis=-1, keepdims=True) * (1.0 / (x.shape[-1] - 1))
    return gamma * (d / (jnp.sqrt(var) + eps)) + beta


# ----------------------------------------------------------------------------- kernel
def transformer_encoder_kernel(
    hid_ref, bias_ref,
    wqkv_ref, bqkv_ref, wo_ref, bo_ref, g1_ref, be1_ref,
    w1_ref, b1_ref, w2_ref, b2_ref, g2_ref, be2_ref,
    out_ref,
    qkv_ref, ctx_ref, inter_ref, inter_bf_ref, acc_ref,
    *, heads_num,
):
    l = pl.program_id(1)          # layer
    f = pl.program_id(2)          # FFN intermediate-dim tile

    # Seed the per-batch hidden state; it is carried across the layer axis inside the
    # output's resident VMEM block (no inter-layer HBM traffic).
    @pl.when((l == 0) & (f == 0))
    def _seed():
        out_ref[0] = hid_ref[0]

    # ---- attention + first residual/LN: once per (batch, layer), at f == 0 --------------
    @pl.when(f == 0)
    def _attention():
        x = out_ref[0]                               # (S, H) bf16, current hidden state
        S, H = x.shape
        dh = H // heads_num
        bias = bias_ref[0]                           # (1, S) key-only additive mask

        qkv = jnp.dot(x, wqkv_ref[0], preferred_element_type=jnp.float32) + bqkv_ref[0]
        qkv_ref[...] = qkv.astype(jnp.bfloat16)      # park in VMEM; bounds live ranges

        # Per-head scores/softmax/context. Each iteration's temporaries die via the
        # ctx_ref store, so nothing big stays live across the (static) head loop.
        # NOTE: for dh == 64 these are half-lane-tile slices; a production version would
        # process heads in 128-lane pairs (or batch the heads in one einsum) for alignment.
        for h in range(heads_num):
            off = h * dh
            qh = qkv_ref[:, off:off + dh]                       # (S, dh) bf16 (scale baked in)
            kh = qkv_ref[:, H + off:H + off + dh]
            vh = qkv_ref[:, 2 * H + off:2 * H + off + dh]
            s = jax.lax.dot_general(qh, kh, (((1,), (1,)), ((), ())),
                                    preferred_element_type=jnp.float32)   # (S, S) = q @ k^T
            s = s + bias
            m = jnp.max(s, axis=-1, keepdims=True)
            e = jnp.exp(s - m)
            den = jnp.sum(e, axis=-1, keepdims=True)
            probs = e * pl.reciprocal(den, approx=True)
            ctx = jnp.dot(probs.astype(jnp.bfloat16), vh,
                          preferred_element_type=jnp.float32)             # (S, dh)
            ctx_ref[:, off:off + dh] = ctx.astype(jnp.bfloat16)

        # Fused output projection: one (S, H) @ (H, H) matmul, K = H (full MXU depth).
        attn = jnp.dot(ctx_ref[...], wo_ref[0], preferred_element_type=jnp.float32)

        inter = _layer_norm(attn + bo_ref[0] + x.astype(jnp.float32), g1_ref[0], be1_ref[0])
        inter_ref[...] = inter                           # f32 copy for the second residual
        inter_bf_ref[...] = inter.astype(jnp.bfloat16)   # bf16 copy fed to the FFN matmuls

    # ---- position-wise FFN, tiled over the intermediate dim F ---------------------------
    h1 = jnp.dot(inter_bf_ref[...], w1_ref[0], preferred_element_type=jnp.float32) + b1_ref[0]
    h1 = _gelu_exact(h1)
    h2 = jnp.dot(h1.astype(jnp.bfloat16), w2_ref[0], preferred_element_type=jnp.float32)

    @pl.when(f == 0)
    def _store_first():               # first tile: store directly, no zero-init pass
        acc_ref[...] = h2

    @pl.when(f > 0)
    def _accumulate():
        acc_ref[...] += h2

    # ---- second residual/LN + write the new hidden state on the last F tile -------------
    @pl.when(f == pl.num_programs(2) - 1)
    def _finalize():
        ffn = acc_ref[...] + b2_ref[0]
        hid_new = _layer_norm(ffn + inter_ref[...], g2_ref[0], be2_ref[0])
        out_ref[0] = hid_new.astype(jnp.bfloat16)


# ----------------------------------------------------------------------------- wrapper
def _choose_f_tile(F):
    # Bigger tiles -> fewer grid steps / less acc re-read; keep NF >= 2-3 on real configs.
    if F <= 1024:
        return F
    for tf in (1024, 768, 512, 384, 256, 128):
        if F % tf == 0:
            return tf
    return F


def _vmem_limit_bytes():
    # Generation-aware scoped-VMEM budget: leave headroom below physical capacity
    # (v7x: 64 MiB/TC -> ~48 MiB; v5e/v6e: 128 MiB -> up to 100 MiB).
    try:
        cap = pltpu.get_tpu_info().vmem_capacity_bytes
    except Exception:
        cap = 64 * 1024 * 1024
    return int(max(32 * 1024 * 1024, min(cap - 16 * 1024 * 1024, 100 * 1024 * 1024)))


def prepare_stacked_params(layer_params, heads_num):
    """Host-side prep: fuse QKV, bake 1/sqrt(dh) into Wq/bq, cast matmul weights to bf16,
    keep biases / LN params as (1, N) f32, and stack everything with a leading layer axis."""
    H = layer_params[0]["wq"].shape[0]
    dh = H // heads_num
    scale = 1.0 / math.sqrt(dh)
    as2d = lambda v: v.reshape(1, -1).astype(jnp.float32)

    def one(p):
        wqkv = jnp.concatenate([p["wq"] * scale, p["wk"], p["wv"]], axis=1)
        bqkv = jnp.concatenate([p["bq"] * scale, p["bk"], p["bv"]])
        return dict(
            wqkv=wqkv.astype(jnp.bfloat16), bqkv=as2d(bqkv),
            wo=p["wo"].astype(jnp.bfloat16), bo=as2d(p["bo"]),
            ln1_g=as2d(p["ln1_g"]), ln1_b=as2d(p["ln1_b"]),
            w1=p["w1"].astype(jnp.bfloat16), b1=as2d(p["b1"]),
            w2=p["w2"].astype(jnp.bfloat16), b2=as2d(p["b2"]),
            ln2_g=as2d(p["ln2_g"]), ln2_b=as2d(p["ln2_b"]),
        )

    prepped = [one(p) for p in layer_params]
    return {k: jnp.stack([pp[k] for pp in prepped], axis=0) for k in prepped[0]}


def transformer_encoder(emb, seg, layer_params, heads_num):
    """emb: [B, S, H] float32, seg: [B, S] int32 -> hidden [B, S, H] float32 (post-LN)."""
    B, S, H = emb.shape
    assert H % heads_num == 0

    # mask == 'fully_visible': key-only additive bias (1 - (seg > 0)) * -10000, kept as
    # (B, 1, S) and broadcast over queries in-kernel (identical to the (B,1,S,S) repeat).
    key_mask = (seg > 0).astype(jnp.float32)
    bias = ((1.0 - key_mask) * -10000.0)[:, None, :]

    pp = prepare_stacked_params(layer_params, heads_num)
    L = pp["wqkv"].shape[0]
    F = pp["w1"].shape[2]
    TF = _choose_f_tile(F)
    NF = F // TF

    hidden_bf = emb.astype(jnp.bfloat16)

    idx_b = lambda b, l, f: (b, 0, 0)
    idx_l = lambda b, l, f: (l, 0, 0)

    in_specs = [
        pl.BlockSpec((1, S, H), idx_b),                       # hidden (bf16, read at l==0)
        pl.BlockSpec((1, 1, S), idx_b),                       # key-only mask bias
        pl.BlockSpec((1, H, 3 * H), idx_l),                   # fused Wqkv (streamed per layer)
        pl.BlockSpec((1, 1, 3 * H), idx_l),                   # bqkv
        pl.BlockSpec((1, H, H), idx_l),                       # Wo
        pl.BlockSpec((1, 1, H), idx_l),                       # bo
        pl.BlockSpec((1, 1, H), idx_l),                       # ln1 gamma
        pl.BlockSpec((1, 1, H), idx_l),                       # ln1 beta
        pl.BlockSpec((1, H, TF), lambda b, l, f: (l, 0, f)),  # W1 tile (streamed over F)
        pl.BlockSpec((1, 1, TF), lambda b, l, f: (l, 0, f)),  # b1 tile
        pl.BlockSpec((1, TF, H), lambda b, l, f: (l, f, 0)),  # W2 tile (streamed over F)
        pl.BlockSpec((1, 1, H), idx_l),                       # b2
        pl.BlockSpec((1, 1, H), idx_l),                       # ln2 gamma
        pl.BlockSpec((1, 1, H), idx_l),                       # ln2 beta
    ]

    # TODO(synk): when B == 1 on v7x (2 TensorCores) add a second 'parallel' axis
    # (query-block / head-group sharding) so the second core is not idle.
    out = pl.pallas_call(
        functools.partial(transformer_encoder_kernel, heads_num=heads_num),
        out_shape=jax.ShapeDtypeStruct((B, S, H), jnp.bfloat16),
        grid=(B, L, NF),
        in_specs=in_specs,
        out_specs=pl.BlockSpec((1, S, H), idx_b),
        scratch_shapes=[
            pltpu.VMEM((S, 3 * H), jnp.bfloat16),   # qkv
            pltpu.VMEM((S, H), jnp.bfloat16),       # per-head context (head-major columns)
            pltpu.VMEM((S, H), jnp.float32),        # inter (post-attn LN, f32 for residual)
            pltpu.VMEM((S, H), jnp.bfloat16),       # inter (bf16 copy for FFN matmul input)
            pltpu.VMEM((S, H), jnp.float32),        # FFN accumulator
        ],
        compiler_params=pltpu.CompilerParams(
            dimension_semantics=("parallel", "arbitrary", "arbitrary"),
            vmem_limit_bytes=_vmem_limit_bytes(),
        ),
    )(
        hidden_bf, bias,
        pp["wqkv"], pp["bqkv"], pp["wo"], pp["bo"], pp["ln1_g"], pp["ln1_b"],
        pp["w1"], pp["b1"], pp["w2"], pp["b2"], pp["ln2_g"], pp["ln2_b"],
    )
    # layernorm_positioning == 'post' -> no final layer norm; return f32 like the module.
    return out.astype(jnp.float32)


# ----------------------------------------------------------------------------- test setup
def init_layer_params(key, layers_num, H, F):
    params = []
    for l in range(layers_num):
        ks = jax.random.split(jax.random.fold_in(key, l), 6)
        w = lambda k, shape: (jax.random.normal(k, shape, jnp.float32) * 0.02)
        params.append(dict(
            wq=w(ks[0], (H, H)), bq=jnp.zeros((H,), jnp.float32),
            wk=w(ks[1], (H, H)), bk=jnp.zeros((H,), jnp.float32),
            wv=w(ks[2], (H, H)), bv=jnp.zeros((H,), jnp.float32),
            wo=w(ks[3], (H, H)), bo=jnp.zeros((H,), jnp.float32),
            ln1_g=jnp.ones((H,), jnp.float32), ln1_b=jnp.zeros((H,), jnp.float32),
            w1=w(ks[4], (H, F)), b1=jnp.zeros((F,), jnp.float32),
            w2=w(ks[5], (F, H)), b2=jnp.zeros((H,), jnp.float32),
            ln2_g=jnp.ones((H,), jnp.float32), ln2_b=jnp.zeros((H,), jnp.float32),
        ))
    return params


if __name__ == "__main__":
    B, S, H, heads_num, layers_num = 2, 8, 32, 4, 2
    F = 4 * H

    key = jax.random.PRNGKey(0)
    k_emb, k_par = jax.random.split(key)

    emb = jax.random.normal(k_emb, (B, S, H), jnp.float32)
    seg = jnp.array([[1, 1, 1, 1, 1, 1, 0, 0],
                     [1, 1, 1, 1, 1, 1, 1, 1]], dtype=jnp.int32)
    params = init_layer_params(k_par, layers_num, H, F)

    out = transformer_encoder(emb, seg, params, heads_num)
    out = jax.block_until_ready(out)
    assert out.shape == (B, S, H) and out.dtype == jnp.float32
    assert bool(jnp.all(jnp.isfinite(out)))
    print("KERNEL_OK")
</pallas_src>

<mosaic_0001>
module attributes {stable_mosaic.version = 11 : i64} {
  func.func @transformer_encoder_kernel(%arg0: i32, %arg1: i32, %arg2: i32, %arg3: memref<1x8x32xbf16, #tpu.memory_space<vmem>>, %arg4: memref<1x1x8xf32, #tpu.memory_space<vmem>>, %arg5: memref<1x32x96xbf16, #tpu.memory_space<vmem>>, %arg6: memref<1x1x96xf32, #tpu.memory_space<vmem>>, %arg7: memref<1x32x32xbf16, #tpu.memory_space<vmem>>, %arg8: memref<1x1x32xf32, #tpu.memory_space<vmem>>, %arg9: memref<1x1x32xf32, #tpu.memory_space<vmem>>, %arg10: memref<1x1x32xf32, #tpu.memory_space<vmem>>, %arg11: memref<1x32x128xbf16, #tpu.memory_space<vmem>>, %arg12: memref<1x1x128xf32, #tpu.memory_space<vmem>>, %arg13: memref<1x128x32xbf16, #tpu.memory_space<vmem>>, %arg14: memref<1x1x32xf32, #tpu.memory_space<vmem>>, %arg15: memref<1x1x32xf32, #tpu.memory_space<vmem>>, %arg16: memref<1x1x32xf32, #tpu.memory_space<vmem>>, %arg17: memref<1x8x32xbf16, #tpu.memory_space<vmem>>, %arg18: memref<8x96xbf16, #tpu.memory_space<vmem>>, %arg19: memref<8x32xbf16, #tpu.memory_space<vmem>>, %arg20: memref<8x32xf32, #tpu.memory_space<vmem>>, %arg21: memref<8x32xbf16, #tpu.memory_space<vmem>>, %arg22: memref<8x32xf32, #tpu.memory_space<vmem>>) attributes {dimension_semantics = [#tpu.dimension_semantics<parallel>, #tpu.dimension_semantics<arbitrary>, #tpu.dimension_semantics<arbitrary>], iteration_bounds = array<i64: 2, 2, 1>, scalar_prefetch = 0 : i64, scratch_operands = 5 : i64, tpu.core_type = #tpu.core_type<tc>, window_params = [{transform_indices = @transform_0, window_bounds = array<i64: 1, 8, 32>}, {transform_indices = @transform_1, window_bounds = array<i64: 1, 1, 8>}, {transform_indices = @transform_2, window_bounds = array<i64: 1, 32, 96>}, {transform_indices = @transform_3, window_bounds = array<i64: 1, 1, 96>}, {transform_indices = @transform_4, window_bounds = array<i64: 1, 32, 32>}, {transform_indices = @transform_5, window_bounds = array<i64: 1, 1, 32>}, {transform_indices = @transform_6, window_bounds = array<i64: 1, 1, 32>}, {transform_indices = @transform_7, window_bounds = array<i64: 1, 1, 32>}, {transform_indices = @transform_8, window_bounds = array<i64: 1, 32, 128>}, {transform_indices = @transform_9, window_bounds = array<i64: 1, 1, 128>}, {transform_indices = @transform_10, window_bounds = array<i64: 1, 128, 32>}, {transform_indices = @transform_11, window_bounds = array<i64: 1, 1, 32>}, {transform_indices = @transform_12, window_bounds = array<i64: 1, 1, 32>}, {transform_indices = @transform_13, window_bounds = array<i64: 1, 1, 32>}, {transform_indices = @transform_14, window_bounds = array<i64: 1, 8, 32>}]} {
    %c0_i32 = arith.constant 0 : i32
    %0 = arith.cmpi eq, %arg1, %c0_i32 : i32
    %c0_i32_0 = arith.constant 0 : i32
    %1 = arith.cmpi eq, %arg2, %c0_i32_0 : i32
    %2 = arith.andi %0, %1 : i1
    %3 = arith.extui %2 : i1 to i32
    %c0_i32_1 = arith.constant 0 : i32
    %4 = arith.cmpi ne, %3, %c0_i32_1 : i32
    scf.if %4 {
      %c0_36 = arith.constant 0 : index
      %c0_37 = arith.constant 0 : index
      %c0_38 = arith.constant 0 : index
      %69 = vector.load %arg3[%c0_36, %c0_37, %c0_38] : memref<1x8x32xbf16, #tpu.memory_space<vmem>>, vector<1x8x32xbf16>
      %70 = vector.shape_cast %69 : vector<1x8x32xbf16> to vector<8x32xbf16>
      %c0_39 = arith.constant 0 : index
      %c0_40 = arith.constant 0 : index
      %c0_41 = arith.constant 0 : index
      %71 = vector.load %arg17[%c0_39, %c0_40, %c0_41] : memref<1x8x32xbf16, #tpu.memory_space<vmem>>, vector<1x8x32xbf16>
      %72 = vector.shape_cast %71 : vector<1x8x32xbf16> to vector<8x32xbf16>
      %73 = vector.shape_cast %70 : vector<8x32xbf16> to vector<1x8x32xbf16>
      tpu.vector_store %arg17[%c0_39, %c0_40, %c0_41], %73 {strides = array<i32>} : memref<1x8x32xbf16, #tpu.memory_space<vmem>>, vector<1x8x32xbf16>,
    } else {
    }
    %c0_i32_2 = arith.constant 0 : i32
    %5 = arith.cmpi eq, %arg2, %c0_i32_2 : i32
    %6 = arith.extui %5 : i1 to i32
    %c0_i32_3 = arith.constant 0 : i32
    %7 = arith.cmpi ne, %6, %c0_i32_3 : i32
    scf.if %7 {
      %c0_36 = arith.constant 0 : index
      %c0_37 = arith.constant 0 : index
      %c0_38 = arith.constant 0 : index
      %69 = vector.load %arg17[%c0_36, %c0_37, %c0_38] : memref<1x8x32xbf16, #tpu.memory_space<vmem>>, vector<1x8x32xbf16>
      %70 = vector.shape_cast %69 : vector<1x8x32xbf16> to vector<8x32xbf16>
      %c0_39 = arith.constant 0 : index
      %c0_40 = arith.constant 0 : index
      %c0_41 = arith.constant 0 : index
      %71 = vector.load %arg4[%c0_39, %c0_40, %c0_41] : memref<1x1x8xf32, #tpu.memory_space<vmem>>, vector<1x1x8xf32>
      %72 = vector.shape_cast %71 : vector<1x1x8xf32> to vector<1x8xf32>
      %c0_42 = arith.constant 0 : index
      %c0_43 = arith.constant 0 : index
      %c0_44 = arith.constant 0 : index
      %73 = vector.load %arg5[%c0_42, %c0_43, %c0_44] : memref<1x32x96xbf16, #tpu.memory_space<vmem>>, vector<1x32x96xbf16>
      %74 = vector.shape_cast %73 : vector<1x32x96xbf16> to vector<32x96xbf16>
      %cst_45 = arith.constant dense<0.000000e+00> : vector<8x96xf32>
      %75 = tpu.matmul %70, %74, %cst_45 {dimension_numbers = #tpu.dot_dimension_numbers<[1], [0], [0], [1], [0, 0, 1, 1], [], []>} : vector<8x32xbf16>, vector<32x96xbf16>, vector<8x96xf32> -> vector<8x96xf32>
      %c0_46 = arith.constant 0 : index
      %c0_47 = arith.constant 0 : index
      %c0_48 = arith.constant 0 : index
      %76 = vector.load %arg6[%c0_46, %c0_47, %c0_48] : memref<1x1x96xf32, #tpu.memory_space<vmem>>, vector<1x1x96xf32>
      %77 = vector.shape_cast %76 : vector<1x1x96xf32> to vector<1x96xf32>
      %78 = vector.broadcast %77 : vector<1x96xf32> to vector<8x96xf32>
      %79 = arith.addf %75, %78 : vector<8x96xf32>
      %80 = arith.truncf %79 : vector<8x96xf32> to vector<8x96xbf16>
      %c0_49 = arith.constant 0 : index
      %c0_50 = arith.constant 0 : index
      %81 = vector.load %arg18[%c0_49, %c0_50] : memref<8x96xbf16, #tpu.memory_space<vmem>>, vector<8x96xbf16>
      tpu.vector_store %arg18[%c0_49, %c0_50], %80 {strides = array<i32>} : memref<8x96xbf16, #tpu.memory_space<vmem>>, vector<8x96xbf16>,
      %c0_51 = arith.constant 0 : index
      %c0_52 = arith.constant 0 : index
      %82 = vector.load %arg18[%c0_51, %c0_52] : memref<8x96xbf16, #tpu.memory_space<vmem>>, vector<8x8xbf16>
      %c0_53 = arith.constant 0 : index
      %c32 = arith.constant 32 : index
      %83 = vector.load %arg18[%c0_53, %c32] : memref<8x96xbf16, #tpu.memory_space<vmem>>, vector<8x8xbf16>
      %c0_54 = arith.constant 0 : index
      %c64 = arith.constant 64 : index
      %84 = vector.load %arg18[%c0_54, %c64] : memref<8x96xbf16, #tpu.memory_space<vmem>>, vector<8x8xbf16>
      %cst_55 = arith.constant dense<0.000000e+00> : vector<8x8xf32>
      %85 = tpu.matmul %82, %83, %cst_55 {dimension_numbers = #tpu.dot_dimension_numbers<[1], [1], [0], [0], [0, 0, 1, 0], [], []>} : vector<8x8xbf16>, vector<8x8xbf16>, vector<8x8xf32> -> vector<8x8xf32>
      %86 = vector.broadcast %72 : vector<1x8xf32> to vector<8x8xf32>
      %87 = arith.addf %85, %86 : vector<8x8xf32>
      %cst_56 = arith.constant dense<0xFF800000> : vector<8xf32>
      %88 = vector.multi_reduction <maximumf>, %87, %cst_56 [1] : vector<8x8xf32> to vector<8xf32>
      %89 = vector.shape_cast %88 : vector<8xf32> to vector<8x1xf32>
      %90 = vector.broadcast %89 : vector<8x1xf32> to vector<8x8xf32>
      %91 = arith.subf %87, %90 : vector<8x8xf32>
      %92 = math.exp %91 : vector<8x8xf32>
      %cst_57 = arith.constant dense<0.000000e+00> : vector<8xf32>
      %93 = vector.multi_reduction <add>, %92, %cst_57 [1] : vector<8x8xf32> to vector<8xf32>
      %94 = vector.shape_cast %93 : vector<8xf32> to vector<8x1xf32>
      %95 = tpu.reciprocal %94 {approx = true} : vector<8x1xf32> -> vector<8x1xf32>
      %96 = vector.broadcast %95 : vector<8x1xf32> to vector<8x8xf32>
      %97 = arith.mulf %92, %96 : vector<8x8xf32>
      %98 = arith.truncf %97 : vector<8x8xf32> to vector<8x8xbf16>
      %cst_58 = arith.constant dense<0.000000e+00> : vector<8x8xf32>
      %99 = tpu.matmul %98, %84, %cst_58 {dimension_numbers = #tpu.dot_dimension_numbers<[1], [0], [0], [1], [0, 0, 1, 1], [], []>} : vector<8x8xbf16>, vector<8x8xbf16>, vector<8x8xf32> -> vector<8x8xf32>
      %100 = arith.truncf %99 : vector<8x8xf32> to vector<8x8xbf16>
      %c0_59 = arith.constant 0 : index
      %c0_60 = arith.constant 0 : index
      %101 = vector.load %arg19[%c0_59, %c0_60] : memref<8x32xbf16, #tpu.memory_space<vmem>>, vector<8x8xbf16>
      tpu.vector_store %arg19[%c0_59, %c0_60], %100 {strides = array<i32>} : memref<8x32xbf16, #tpu.memory_space<vmem>>, vector<8x8xbf16>,
      %c0_61 = arith.constant 0 : index
      %c8 = arith.constant 8 : index
      %102 = vector.load %arg18[%c0_61, %c8] : memref<8x96xbf16, #tpu.memory_space<vmem>>, vector<8x8xbf16>
      %c0_62 = arith.constant 0 : index
      %c40 = arith.constant 40 : index
      %103 = vector.load %arg18[%c0_62, %c40] : memref<8x96xbf16, #tpu.memory_space<vmem>>, vector<8x8xbf16>
      %c0_63 = arith.constant 0 : index
      %c72 = arith.constant 72 : index
      %104 = vector.load %arg18[%c0_63, %c72] : memref<8x96xbf16, #tpu.memory_space<vmem>>, vector<8x8xbf16>
      %cst_64 = arith.constant dense<0.000000e+00> : vector<8x8xf32>
      %105 = tpu.matmul %102, %103, %cst_64 {dimension_numbers = #tpu.dot_dimension_numbers<[1], [1], [0], [0], [0, 0, 1, 0], [], []>} : vector<8x8xbf16>, vector<8x8xbf16>, vector<8x8xf32> -> vector<8x8xf32>
      %106 = vector.broadcast %72 : vector<1x8xf32> to vector<8x8xf32>
      %107 = arith.addf %105, %106 : vector<8x8xf32>
      %cst_65 = arith.constant dense<0xFF800000> : vector<8xf32>
      %108 = vector.multi_reduction <maximumf>, %107, %cst_65 [1] : vector<8x8xf32> to vector<8xf32>
      %109 = vector.shape_cast %108 : vector<8xf32> to vector<8x1xf32>
      %110 = vector.broadcast %109 : vector<8x1xf32> to vector<8x8xf32>
      %111 = arith.subf %107, %110 : vector<8x8xf32>
      %112 = math.exp %111 : vector<8x8xf32>
      %cst_66 = arith.constant dense<0.000000e+00> : vector<8xf32>
      %113 = vector.multi_reduction <add>, %112, %cst_66 [1] : vector<8x8xf32> to vector<8xf32>
      %114 = vector.shape_cast %113 : vector<8xf32> to vector<8x1xf32>
      %115 = tpu.reciprocal %114 {approx = true} : vector<8x1xf32> -> vector<8x1xf32>
      %116 = vector.broadcast %115 : vector<8x1xf32> to vector<8x8xf32>
      %117 = arith.mulf %112, %116 : vector<8x8xf32>
      %118 = arith.truncf %117 : vector<8x8xf32> to vector<8x8xbf16>
      %cst_67 = arith.constant dense<0.000000e+00> : vector<8x8xf32>
      %119 = tpu.matmul %118, %104, %cst_67 {dimension_numbers = #tpu.dot_dimension_numbers<[1], [0], [0], [1], [0, 0, 1, 1], [], []>} : vector<8x8xbf16>, vector<8x8xbf16>, vector<8x8xf32> -> vector<8x8xf32>
      %120 = arith.truncf %119 : vector<8x8xf32> to vector<8x8xbf16>
      %c0_68 = arith.constant 0 : index
      %c8_69 = arith.constant 8 : index
      %121 = vector.load %arg19[%c0_68, %c8_69] : memref<8x32xbf16, #tpu.memory_space<vmem>>, vector<8x8xbf16>
      tpu.vector_store %arg19[%c0_68, %c8_69], %120 {strides = array<i32>} : memref<8x32xbf16, #tpu.memory_space<vmem>>, vector<8x8xbf16>,
      %c0_70 = arith.constant 0 : index
      %c16 = arith.constant 16 : index
      %122 = vector.load %arg18[%c0_70, %c16] : memref<8x96xbf16, #tpu.memory_space<vmem>>, vector<8x8xbf16>
      %c0_71 = arith.constant 0 : index
      %c48 = arith.constant 48 : index
      %123 = vector.load %arg18[%c0_71, %c48] : memref<8x96xbf16, #tpu.memory_space<vmem>>, vector<8x8xbf16>
      %c0_72 = arith.constant 0 : index
      %c80 = arith.constant 80 : index
      %124 = vector.load %arg18[%c0_72, %c80] : memref<8x96xbf16, #tpu.memory_space<vmem>>, vector<8x8xbf16>
      %cst_73 = arith.constant dense<0.000000e+00> : vector<8x8xf32>
      %125 = tpu.matmul %122, %123, %cst_73 {dimension_numbers = #tpu.dot_dimension_numbers<[1], [1], [0], [0], [0, 0, 1, 0], [], []>} : vector<8x8xbf16>, vector<8x8xbf16>, vector<8x8xf32> -> vector<8x8xf32>
      %126 = vector.broadcast %72 : vector<1x8xf32> to vector<8x8xf32>
      %127 = arith.addf %125, %126 : vector<8x8xf32>
      %cst_74 = arith.constant dense<0xFF800000> : vector<8xf32>
      %128 = vector.multi_reduction <maximumf>, %127, %cst_74 [1] : vector<8x8xf32> to vector<8xf32>
      %129 = vector.shape_cast %128 : vector<8xf32> to vector<8x1xf32>
      %130 = vector.broadcast %129 : vector<8x1xf32> to vector<8x8xf32>
      %131 = arith.subf %127, %130 : vector<8x8xf32>
      %132 = math.exp %131 : vector<8x8xf32>
      %cst_75 = arith.constant dense<0.000000e+00> : vector<8xf32>
      %133 = vector.multi_reduction <add>, %132, %cst_75 [1] : vector<8x8xf32> to vector<8xf32>
      %134 = vector.shape_cast %133 : vector<8xf32> to vector<8x1xf32>
      %135 = tpu.reciprocal %134 {approx = true} : vector<8x1xf32> -> vector<8x1xf32>
      %136 = vector.broadcast %135 : vector<8x1xf32> to vector<8x8xf32>
      %137 = arith.mulf %132, %136 : vector<8x8xf32>
      %138 = arith.truncf %137 : vector<8x8xf32> to vector<8x8xbf16>
      %cst_76 = arith.constant dense<0.000000e+00> : vector<8x8xf32>
      %139 = tpu.matmul %138, %124, %cst_76 {dimension_numbers = #tpu.dot_dimension_numbers<[1], [0], [0], [1], [0, 0, 1, 1], [], []>} : vector<8x8xbf16>, vector<8x8xbf16>, vector<8x8xf32> -> vector<8x8xf32>
      %140 = arith.truncf %139 : vector<8x8xf32> to vector<8x8xbf16>
      %c0_77 = arith.constant 0 : index
      %c16_78 = arith.constant 16 : index
      %141 = vector.load %arg19[%c0_77, %c16_78] : memref<8x32xbf16, #tpu.memory_space<vmem>>, vector<8x8xbf16>
      tpu.vector_store %arg19[%c0_77, %c16_78], %140 {strides = array<i32>} : memref<8x32xbf16, #tpu.memory_space<vmem>>, vector<8x8xbf16>,
      %c0_79 = arith.constant 0 : index
      %c24 = arith.constant 24 : index
      %142 = vector.load %arg18[%c0_79, %c24] : memref<8x96xbf16, #tpu.memory_space<vmem>>, vector<8x8xbf16>
      %c0_80 = arith.constant 0 : index
      %c56 = arith.constant 56 : index
      %143 = vector.load %arg18[%c0_80, %c56] : memref<8x96xbf16, #tpu.memory_space<vmem>>, vector<8x8xbf16>
      %c0_81 = arith.constant 0 : index
      %c88 = arith.constant 88 : index
      %144 = vector.load %arg18[%c0_81, %c88] : memref<8x96xbf16, #tpu.memory_space<vmem>>, vector<8x8xbf16>
      %cst_82 = arith.constant dense<0.000000e+00> : vector<8x8xf32>
      %145 = tpu.matmul %142, %143, %cst_82 {dimension_numbers = #tpu.dot_dimension_numbers<[1], [1], [0], [0], [0, 0, 1, 0], [], []>} : vector<8x8xbf16>, vector<8x8xbf16>, vector<8x8xf32> -> vector<8x8xf32>
      %146 = vector.broadcast %72 : vector<1x8xf32> to vector<8x8xf32>
      %147 = arith.addf %145, %146 : vector<8x8xf32>
      %cst_83 = arith.constant dense<0xFF800000> : vector<8xf32>
      %148 = vector.multi_reduction <maximumf>, %147, %cst_83 [1] : vector<8x8xf32> to vector<8xf32>
      %149 = vector.shape_cast %148 : vector<8xf32> to vector<8x1xf32>
      %150 = vector.broadcast %149 : vector<8x1xf32> to vector<8x8xf32>
      %151 = arith.subf %147, %150 : vector<8x8xf32>
      %152 = math.exp %151 : vector<8x8xf32>
      %cst_84 = arith.constant dense<0.000000e+00> : vector<8xf32>
      %153 = vector.multi_reduction <add>, %152, %cst_84 [1] : vector<8x8xf32> to vector<8xf32>
      %154 = vector.shape_cast %153 : vector<8xf32> to vector<8x1xf32>
      %155 = tpu.reciprocal %154 {approx = true} : vector<8x1xf32> -> vector<8x1xf32>
      %156 = vector.broadcast %155 : vector<8x1xf32> to vector<8x8xf32>
      %157 = arith.mulf %152, %156 : vector<8x8xf32>
      %158 = arith.truncf %157 : vector<8x8xf32> to vector<8x8xbf16>
      %cst_85 = arith.constant dense<0.000000e+00> : vector<8x8xf32>
      %159 = tpu.matmul %158, %144, %cst_85 {dimension_numbers = #tpu.dot_dimension_numbers<[1], [0], [0], [1], [0, 0, 1, 1], [], []>} : vector<8x8xbf16>, vector<8x8xbf16>, vector<8x8xf32> -> vector<8x8xf32>
      %160 = arith.truncf %159 : vector<8x8xf32> to vector<8x8xbf16>
      %c0_86 = arith.constant 0 : index
      %c24_87 = arith.constant 24 : index
      %161 = vector.load %arg19[%c0_86, %c24_87] : memref<8x32xbf16, #tpu.memory_space<vmem>>, vector<8x8xbf16>
      tpu.vector_store %arg19[%c0_86, %c24_87], %160 {strides = array<i32>} : memref<8x32xbf16, #tpu.memory_space<vmem>>, vector<8x8xbf16>,
      %c0_88 = arith.constant 0 : index
      %c0_89 = arith.constant 0 : index
      %162 = vector.load %arg19[%c0_88, %c0_89] : memref<8x32xbf16, #tpu.memory_space<vmem>>, vector<8x32xbf16>
      %c0_90 = arith.constant 0 : index
      %c0_91 = arith.constant 0 : index
      %c0_92 = arith.constant 0 : index
      %163 = vector.load %arg7[%c0_90, %c0_91, %c0_92] : memref<1x32x32xbf16, #tpu.memory_space<vmem>>, vector<1x32x32xbf16>
      %164 = vector.shape_cast %163 : vector<1x32x32xbf16> to vector<32x32xbf16>
      %cst_93 = arith.constant dense<0.000000e+00> : vector<8x32xf32>
      %165 = tpu.matmul %162, %164, %cst_93 {dimension_numbers = #tpu.dot_dimension_numbers<[1], [0], [0], [1], [0, 0, 1, 1], [], []>} : vector<8x32xbf16>, vector<32x32xbf16>, vector<8x32xf32> -> vector<8x32xf32>
      %c0_94 = arith.constant 0 : index
      %c0_95 = arith.constant 0 : index
      %c0_96 = arith.constant 0 : index
      %166 = vector.load %arg8[%c0_94, %c0_95, %c0_96] : memref<1x1x32xf32, #tpu.memory_space<vmem>>, vector<1x1x32xf32>
      %167 = vector.shape_cast %166 : vector<1x1x32xf32> to vector<1x32xf32>
      %168 = vector.broadcast %167 : vector<1x32xf32> to vector<8x32xf32>
      %169 = arith.addf %165, %168 : vector<8x32xf32>
      %170 = arith.extf %70 : vector<8x32xbf16> to vector<8x32xf32>
      %171 = arith.addf %169, %170 : vector<8x32xf32>
      %c0_97 = arith.constant 0 : index
      %c0_98 = arith.constant 0 : index
      %c0_99 = arith.constant 0 : index
      %172 = vector.load %arg9[%c0_97, %c0_98, %c0_99] : memref<1x1x32xf32, #tpu.memory_space<vmem>>, vector<1x1x32xf32>
      %173 = vector.shape_cast %172 : vector<1x1x32xf32> to vector<1x32xf32>
      %c0_100 = arith.constant 0 : index
      %c0_101 = arith.constant 0 : index
      %c0_102 = arith.constant 0 : index
      %174 = vector.load %arg10[%c0_100, %c0_101, %c0_102] : memref<1x1x32xf32, #tpu.memory_space<vmem>>, vector<1x1x32xf32>
      %175 = vector.shape_cast %174 : vector<1x1x32xf32> to vector<1x32xf32>
      %cst_103 = arith.constant dense<0.000000e+00> : vector<8xf32>
      %176 = vector.multi_reduction <add>, %171, %cst_103 [1] : vector<8x32xf32> to vector<8xf32>
      %177 = vector.shape_cast %176 : vector<8xf32> to vector<8x1xf32>
      %cst_104 = arith.constant 3.200000e+01 : f32
      %178 = vector.broadcast %cst_104 : f32 to vector<8x1xf32>
      %179 = arith.divf %177, %178 : vector<8x1xf32>
      %180 = vector.broadcast %179 : vector<8x1xf32> to vector<8x32xf32>
      %181 = arith.subf %171, %180 : vector<8x32xf32>
      %182 = arith.mulf %181, %181 : vector<8x32xf32>
      %cst_105 = arith.constant dense<0.000000e+00> : vector<8xf32>
      %183 = vector.multi_reduction <add>, %182, %cst_105 [1] : vector<8x32xf32> to vector<8xf32>
      %184 = vector.shape_cast %183 : vector<8xf32> to vector<8x1xf32>
      %cst_106 = arith.constant 0.0322580636 : f32
      %185 = vector.broadcast %cst_106 : f32 to vector<8x1xf32>
      %186 = arith.mulf %184, %185 : vector<8x1xf32>
      %187 = math.sqrt %186 : vector<8x1xf32>
      %cst_107 = arith.constant 9.99999997E-7 : f32
      %188 = vector.broadcast %cst_107 : f32 to vector<8x1xf32>
      %189 = arith.addf %187, %188 : vector<8x1xf32>
      %190 = vector.broadcast %189 : vector<8x1xf32> to vector<8x32xf32>
      %191 = arith.divf %181, %190 : vector<8x32xf32>
      %192 = vector.broadcast %173 : vector<1x32xf32> to vector<8x32xf32>
      %193 = arith.mulf %192, %191 : vector<8x32xf32>
      %194 = vector.broadcast %175 : vector<1x32xf32> to vector<8x32xf32>
      %195 = arith.addf %193, %194 : vector<8x32xf32>
      %c0_108 = arith.constant 0 : index
      %c0_109 = arith.constant 0 : index
      %196 = vector.load %arg20[%c0_108, %c0_109] : memref<8x32xf32, #tpu.memory_space<vmem>>, vector<8x32xf32>
      tpu.vector_store %arg20[%c0_108, %c0_109], %195 {strides = array<i32>} : memref<8x32xf32, #tpu.memory_space<vmem>>, vector<8x32xf32>,
      %197 = arith.truncf %195 : vector<8x32xf32> to vector<8x32xbf16>
      %c0_110 = arith.constant 0 : index
      %c0_111 = arith.constant 0 : index
      %198 = vector.load %arg21[%c0_110, %c0_111] : memref<8x32xbf16, #tpu.memory_space<vmem>>, vector<8x32xbf16>
      tpu.vector_store %arg21[%c0_110, %c0_111], %197 {strides = array<i32>} : memref<8x32xbf16, #tpu.memory_space<vmem>>, vector<8x32xbf16>,
    } else {
    }
    %c0 = arith.constant 0 : index
    %c0_4 = arith.constant 0 : index
    %8 = vector.load %arg21[%c0, %c0_4] : memref<8x32xbf16, #tpu.memory_space<vmem>>, vector<8x32xbf16>
    %c0_5 = arith.constant 0 : index
    %c0_6 = arith.constant 0 : index
    %c0_7 = arith.constant 0 : index
    %9 = vector.load %arg11[%c0_5, %c0_6, %c0_7] : memref<1x32x128xbf16, #tpu.memory_space<vmem>>, vector<1x32x128xbf16>
    %10 = vector.shape_cast %9 : vector<1x32x128xbf16> to vector<32x128xbf16>
    %cst = arith.constant dense<0.000000e+00> : vector<8x128xf32>
    %11 = tpu.matmul %8, %10, %cst {dimension_numbers = #tpu.dot_dimension_numbers<[1], [0], [0], [1], [0, 0, 1, 1], [], []>} : vector<8x32xbf16>, vector<32x128xbf16>, vector<8x128xf32> -> vector<8x128xf32>
    %c0_8 = arith.constant 0 : index
    %c0_9 = arith.constant 0 : index
    %c0_10 = arith.constant 0 : index
    %12 = vector.load %arg12[%c0_8, %c0_9, %c0_10] : memref<1x1x128xf32, #tpu.memory_space<vmem>>, vector<1x1x128xf32>
    %13 = vector.shape_cast %12 : vector<1x1x128xf32> to vector<1x128xf32>
    %14 = vector.broadcast %13 : vector<1x128xf32> to vector<8x128xf32>
    %15 = arith.addf %11, %14 : vector<8x128xf32>
    %cst_11 = arith.constant 5.000000e-01 : f32
    %16 = vector.broadcast %cst_11 : f32 to vector<8x128xf32>
    %17 = arith.mulf %15, %16 : vector<8x128xf32>
    %cst_12 = arith.constant 0.707106769 : f32
    %18 = vector.broadcast %cst_12 : f32 to vector<8x128xf32>
    %19 = arith.mulf %15, %18 : vector<8x128xf32>
    %20 = math.absf %19 : vector<8x128xf32>
    %cst_13 = arith.constant 0.327591091 : f32
    %21 = vector.broadcast %cst_13 : f32 to vector<8x128xf32>
    %22 = arith.mulf %21, %20 : vector<8x128xf32>
    %cst_14 = arith.constant 1.000000e+00 : f32
    %23 = vector.broadcast %cst_14 : f32 to vector<8x128xf32>
    %24 = arith.addf %23, %22 : vector<8x128xf32>
    %cst_15 = arith.constant 1.000000e+00 : f32
    %25 = vector.broadcast %cst_15 : f32 to vector<8x128xf32>
    %26 = arith.divf %25, %24 : vector<8x128xf32>
    %cst_16 = arith.constant 1.06140542 : f32
    %27 = vector.broadcast %cst_16 : f32 to vector<8x128xf32>
    %28 = arith.mulf %27, %26 : vector<8x128xf32>
    %cst_17 = arith.constant -1.45315206 : f32
    %29 = vector.broadcast %cst_17 : f32 to vector<8x128xf32>
    %30 = arith.addf %28, %29 : vector<8x128xf32>
    %31 = arith.mulf %30, %26 : vector<8x128xf32>
    %cst_18 = arith.constant 1.42141378 : f32
    %32 = vector.broadcast %cst_18 : f32 to vector<8x128xf32>
    %33 = arith.addf %31, %32 : vector<8x128xf32>
    %34 = arith.mulf %33, %26 : vector<8x128xf32>
    %cst_19 = arith.constant -0.284496725 : f32
    %35 = vector.broadcast %cst_19 : f32 to vector<8x128xf32>
    %36 = arith.addf %34, %35 : vector<8x128xf32>
    %37 = arith.mulf %36, %26 : vector<8x128xf32>
    %cst_20 = arith.constant 0.254829586 : f32
    %38 = vector.broadcast %cst_20 : f32 to vector<8x128xf32>
    %39 = arith.addf %37, %38 : vector<8x128xf32>
    %40 = arith.mulf %39, %26 : vector<8x128xf32>
    %cst_21 = arith.constant 0.000000e+00 : f32
    %41 = vector.broadcast %cst_21 : f32 to vector<8x128xf32>
    %42 = arith.subf %41, %20 : vector<8x128xf32>
    %43 = arith.mulf %42, %20 : vector<8x128xf32>
    %44 = math.exp %43 : vector<8x128xf32>
    %45 = arith.mulf %40, %44 : vector<8x128xf32>
    %cst_22 = arith.constant 1.000000e+00 : f32
    %46 = vector.broadcast %cst_22 : f32 to vector<8x128xf32>
    %47 = arith.subf %46, %45 : vector<8x128xf32>
    %cst_23 = arith.constant 0.000000e+00 : f32
    %48 = vector.broadcast %cst_23 : f32 to vector<8x128xf32>
    %49 = arith.cmpf olt, %19, %48 : vector<8x128xf32>
    %cst_24 = arith.constant 0.000000e+00 : f32
    %50 = vector.broadcast %cst_24 : f32 to vector<8x128xf32>
    %51 = arith.subf %50, %47 : vector<8x128xf32>
    %52 = arith.select %49, %51, %47 : vector<8x128xi1>, vector<8x128xf32>
    %cst_25 = arith.constant 1.000000e+00 : f32
    %53 = vector.broadcast %cst_25 : f32 to vector<8x128xf32>
    %54 = arith.addf %53, %52 : vector<8x128xf32>
    %55 = arith.mulf %17, %54 : vector<8x128xf32>
    %56 = arith.truncf %55 : vector<8x128xf32> to vector<8x128xbf16>
    %c0_26 = arith.constant 0 : index
    %c0_27 = arith.constant 0 : index
    %c0_28 = arith.constant 0 : index
    %57 = vector.load %arg13[%c0_26, %c0_27, %c0_28] : memref<1x128x32xbf16, #tpu.memory_space<vmem>>, vector<1x128x32xbf16>
    %58 = vector.shape_cast %57 : vector<1x128x32xbf16> to vector<128x32xbf16>
    %cst_29 = arith.constant dense<0.000000e+00> : vector<8x32xf32>
    %59 = tpu.matmul %56, %58, %cst_29 {dimension_numbers = #tpu.dot_dimension_numbers<[1], [0], [0], [1], [0, 0, 1, 1], [], []>} : vector<8x128xbf16>, vector<128x32xbf16>, vector<8x32xf32> -> vector<8x32xf32>
    %c0_i32_30 = arith.constant 0 : i32
    %60 = arith.cmpi eq, %arg2, %c0_i32_30 : i32
    %61 = arith.extui %60 : i1 to i32
    %c0_i32_31 = arith.constant 0 : i32
    %62 = arith.cmpi ne, %61, %c0_i32_31 : i32
    scf.if %62 {
      %c0_36 = arith.constant 0 : index
      %c0_37 = arith.constant 0 : index
      %69 = vector.load %arg22[%c0_36, %c0_37] : memref<8x32xf32, #tpu.memory_space<vmem>>, vector<8x32xf32>
      tpu.vector_store %arg22[%c0_36, %c0_37], %59 {strides = array<i32>} : memref<8x32xf32, #tpu.memory_space<vmem>>, vector<8x32xf32>,
    } else {
    }
    %c0_i32_32 = arith.constant 0 : i32
    %63 = arith.cmpi sgt, %arg2, %c0_i32_32 : i32
    %64 = arith.extui %63 : i1 to i32
    %c0_i32_33 = arith.constant 0 : i32
    %65 = arith.cmpi ne, %64, %c0_i32_33 : i32
    scf.if %65 {
      %c0_36 = arith.constant 0 : index
      %c0_37 = arith.constant 0 : index
      %69 = vector.load %arg22[%c0_36, %c0_37] : memref<8x32xf32, #tpu.memory_space<vmem>>, vector<8x32xf32>
      %70 = arith.addf %69, %59 : vector<8x32xf32>
      %c0_38 = arith.constant 0 : index
      %c0_39 = arith.constant 0 : index
      %71 = vector.load %arg22[%c0_38, %c0_39] : memref<8x32xf32, #tpu.memory_space<vmem>>, vector<8x32xf32>
      tpu.vector_store %arg22[%c0_38, %c0_39], %70 {strides = array<i32>} : memref<8x32xf32, #tpu.memory_space<vmem>>, vector<8x32xf32>,
    } else {
    }
    %c0_i32_34 = arith.constant 0 : i32
    %66 = arith.cmpi eq, %arg2, %c0_i32_34 : i32
    %67 = arith.extui %66 : i1 to i32
    %c0_i32_35 = arith.constant 0 : i32
    %68 = arith.cmpi ne, %67, %c0_i32_35 : i32
    scf.if %68 {
      %c0_36 = arith.constant 0 : index
      %c0_37 = arith.constant 0 : index
      %69 = vector.load %arg22[%c0_36, %c0_37] : memref<8x32xf32, #tpu.memory_space<vmem>>, vector<8x32xf32>
      %c0_38 = arith.constant 0 : index
      %c0_39 = arith.constant 0 : index
      %c0_40 = arith.constant 0 : index
      %70 = vector.load %arg14[%c0_38, %c0_39, %c0_40] : memref<1x1x32xf32, #tpu.memory_space<vmem>>, vector<1x1x32xf32>
      %71 = vector.shape_cast %70 : vector<1x1x32xf32> to vector<1x32xf32>
      %72 = vector.broadcast %71 : vector<1x32xf32> to vector<8x32xf32>
      %73 = arith.addf %69, %72 : vector<8x32xf32>
      %c0_41 = arith.constant 0 : index
      %c0_42 = arith.constant 0 : index
      %74 = vector.load %arg20[%c0_41, %c0_42] : memref<8x32xf32, #tpu.memory_space<vmem>>, vector<8x32xf32>
      %75 = arith.addf %73, %74 : vector<8x32xf32>
      %c0_43 = arith.constant 0 : index
      %c0_44 = arith.constant 0 : index
      %c0_45 = arith.constant 0 : index
      %76 = vector.load %arg15[%c0_43, %c0_44, %c0_45] : memref<1x1x32xf32, #tpu.memory_space<vmem>>, vector<1x1x32xf32>
      %77 = vector.shape_cast %76 : vector<1x1x32xf32> to vector<1x32xf32>
      %c0_46 = arith.constant 0 : index
      %c0_47 = arith.constant 0 : index
      %c0_48 = arith.constant 0 : index
      %78 = vector.load %arg16[%c0_46, %c0_47, %c0_48] : memref<1x1x32xf32, #tpu.memory_space<vmem>>, vector<1x1x32xf32>
      %79 = vector.shape_cast %78 : vector<1x1x32xf32> to vector<1x32xf32>
      %cst_49 = arith.constant dense<0.000000e+00> : vector<8xf32>
      %80 = vector.multi_reduction <add>, %75, %cst_49 [1] : vector<8x32xf32> to vector<8xf32>
      %81 = vector.shape_cast %80 : vector<8xf32> to vector<8x1xf32>
      %cst_50 = arith.constant 3.200000e+01 : f32
      %82 = vector.broadcast %cst_50 : f32 to vector<8x1xf32>
      %83 = arith.divf %81, %82 : vector<8x1xf32>
      %84 = vector.broadcast %83 : vector<8x1xf32> to vector<8x32xf32>
      %85 = arith.subf %75, %84 : vector<8x32xf32>
      %86 = arith.mulf %85, %85 : vector<8x32xf32>
      %cst_51 = arith.constant dense<0.000000e+00> : vector<8xf32>
      %87 = vector.multi_reduction <add>, %86, %cst_51 [1] : vector<8x32xf32> to vector<8xf32>
      %88 = vector.shape_cast %87 : vector<8xf32> to vector<8x1xf32>
      %cst_52 = arith.constant 0.0322580636 : f32
      %89 = vector.broadcast %cst_52 : f32 to vector<8x1xf32>
      %90 = arith.mulf %88, %89 : vector<8x1xf32>
      %91 = math.sqrt %90 : vector<8x1xf32>
      %cst_53 = arith.constant 9.99999997E-7 : f32
      %92 = vector.broadcast %cst_53 : f32 to vector<8x1xf32>
      %93 = arith.addf %91, %92 : vector<8x1xf32>
      %94 = vector.broadcast %93 : vector<8x1xf32> to vector<8x32xf32>
      %95 = arith.divf %85, %94 : vector<8x32xf32>
      %96 = vector.broadcast %77 : vector<1x32xf32> to vector<8x32xf32>
      %97 = arith.mulf %96, %95 : vector<8x32xf32>
      %98 = vector.broadcast %79 : vector<1x32xf32> to vector<8x32xf32>
      %99 = arith.addf %97, %98 : vector<8x32xf32>
      %100 = arith.truncf %99 : vector<8x32xf32> to vector<8x32xbf16>
      %c0_54 = arith.constant 0 : index
      %c0_55 = arith.constant 0 : index
      %c0_56 = arith.constant 0 : index
      %101 = vector.load %arg17[%c0_54, %c0_55, %c0_56] : memref<1x8x32xbf16, #tpu.memory_space<vmem>>, vector<1x8x32xbf16>
      %102 = vector.shape_cast %101 : vector<1x8x32xbf16> to vector<8x32xbf16>
      %103 = vector.shape_cast %100 : vector<8x32xbf16> to vector<1x8x32xbf16>
      tpu.vector_store %arg17[%c0_54, %c0_55, %c0_56], %103 {strides = array<i32>} : memref<1x8x32xbf16, #tpu.memory_space<vmem>>, vector<1x8x32xbf16>,
    } else {
    }
    return
  }
  func.func @transform_0(%arg0: i32, %arg1: i32, %arg2: i32) -> (i32, i32, i32) {
    %c0_i32 = arith.constant 0 : i32
    %c0_i32_0 = arith.constant 0 : i32
    %c0_i32_1 = arith.constant 0 : i32
    return %arg0, %c0_i32, %c0_i32_0 : i32, i32, i32
  }
  func.func @transform_1(%arg0: i32, %arg1: i32, %arg2: i32) -> (i32, i32, i32) {
    %c0_i32 = arith.constant 0 : i32
    %c0_i32_0 = arith.constant 0 : i32
    %c0_i32_1 = arith.constant 0 : i32
    return %arg0, %c0_i32, %c0_i32_0 : i32, i32, i32
  }
  func.func @transform_2(%arg0: i32, %arg1: i32, %arg2: i32) -> (i32, i32, i32) {
    %c0_i32 = arith.constant 0 : i32
    %c0_i32_0 = arith.constant 0 : i32
    %c0_i32_1 = arith.constant 0 : i32
    return %arg1, %c0_i32, %c0_i32_0 : i32, i32, i32
  }
  func.func @transform_3(%arg0: i32, %arg1: i32, %arg2: i32) -> (i32, i32, i32) {
    %c0_i32 = arith.constant 0 : i32
    %c0_i32_0 = arith.constant 0 : i32
    %c0_i32_1 = arith.constant 0 : i32
    return %arg1, %c0_i32, %c0_i32_0 : i32, i32, i32
  }
  func.func @transform_4(%arg0: i32, %arg1: i32, %arg2: i32) -> (i32, i32, i32) {
    %c0_i32 = arith.constant 0 : i32
    %c0_i32_0 = arith.constant 0 : i32
    %c0_i32_1 = arith.constant 0 : i32
    return %arg1, %c0_i32, %c0_i32_0 : i32, i32, i32
  }
  func.func @transform_5(%arg0: i32, %arg1: i32, %arg2: i32) -> (i32, i32, i32) {
    %c0_i32 = arith.constant 0 : i32
    %c0_i32_0 = arith.constant 0 : i32
    %c0_i32_1 = arith.constant 0 : i32
    return %arg1, %c0_i32, %c0_i32_0 : i32, i32, i32
  }
  func.func @transform_6(%arg0: i32, %arg1: i32, %arg2: i32) -> (i32, i32, i32) {
    %c0_i32 = arith.constant 0 : i32
    %c0_i32_0 = arith.constant 0 : i32
    %c0_i32_1 = arith.constant 0 : i32
    return %arg1, %c0_i32, %c0_i32_0 : i32, i32, i32
  }
  func.func @transform_7(%arg0: i32, %arg1: i32, %arg2: i32) -> (i32, i32, i32) {
    %c0_i32 = arith.constant 0 : i32
    %c0_i32_0 = arith.constant 0 : i32
    %c0_i32_1 = arith.constant 0 : i32
    return %arg1, %c0_i32, %c0_i32_0 : i32, i32, i32
  }
  func.func @transform_8(%arg0: i32, %arg1: i32, %arg2: i32) -> (i32, i32, i32) {
    %c0_i32 = arith.constant 0 : i32
    %c0_i32_0 = arith.constant 0 : i32
    return %arg1, %c0_i32, %arg2 : i32, i32, i32
  }
  func.func @transform_9(%arg0: i32, %arg1: i32, %arg2: i32) -> (i32, i32, i32) {
    %c0_i32 = arith.constant 0 : i32
    %c0_i32_0 = arith.constant 0 : i32
    return %arg1, %c0_i32, %arg2 : i32, i32, i32
  }
  func.func @transform_10(%arg0: i32, %arg1: i32, %arg2: i32) -> (i32, i32, i32) {
    %c0_i32 = arith.constant 0 : i32
    %c0_i32_0 = arith.constant 0 : i32
    return %arg1, %arg2, %c0_i32 : i32, i32, i32
  }
  func.func @transform_11(%arg0: i32, %arg1: i32, %arg2: i32) -> (i32, i32, i32) {
    %c0_i32 = arith.constant 0 : i32
    %c0_i32_0 = arith.constant 0 : i32
    %c0_i32_1 = arith.constant 0 : i32
    return %arg1, %c0_i32, %c0_i32_0 : i32, i32, i32
  }
  func.func @transform_12(%arg0: i32, %arg1: i32, %arg2: i32) -> (i32, i32, i32) {
    %c0_i32 = arith.constant 0 : i32
    %c0_i32_0 = arith.constant 0 : i32
    %c0_i32_1 = arith.constant 0 : i32
    return %arg1, %c0_i32, %c0_i32_0 : i32, i32, i32
  }
  func.func @transform_13(%arg0: i32, %arg1: i32, %arg2: i32) -> (i32, i32, i32) {
    %c0_i32 = arith.constant 0 : i32
    %c0_i32_0 = arith.constant 0 : i32
    %c0_i32_1 = arith.constant 0 : i32
    return %arg1, %c0_i32, %c0_i32_0 : i32, i32, i32
  }
  func.func @transform_14(%arg0: i32, %arg1: i32, %arg2: i32) -> (i32, i32, i32) {
    %c0_i32 = arith.constant 0 : i32
    %c0_i32_0 = arith.constant 0 : i32
    %c0_i32_1 = arith.constant 0 : i32
    return %arg0, %c0_i32, %c0_i32_0 : i32, i32, i32
  }
}

</mosaic_0001>

<bundles_post_ra>
// kernel: tpu_custom_call.1
= control target key start
LH: loop header
LB: loop body
LE: loop exit
PB: predicated region body
PF: predicated region fallthrough
CT: control target
= control target key end

     0   :  { %s2794_s0 = inlined_call_operand.vmem [shape: bf16[2,8,32], index: 0, kind: input, shape index: {}]   ;;  %s2795_s1 = inlined_call_operand.vmem [shape: f32[2,1,8], index: 1, kind: input, shape index: {}]   ;;  %s2796_s2 = inlined_call_operand.vmem [shape: bf16[2,32,96], index: 2, kind: input, shape index: {}]   ;;  %s2797_s3 = inlined_call_operand.vmem [shape: f32[2,1,96], index: 3, kind: input, shape index: {}]   ;;  %s2798_s4 = inlined_call_operand.vmem [shape: bf16[2,32,32], index: 4, kind: input, shape index: {}]   ;;  %s2799_s5 = inlined_call_operand.vmem [shape: f32[2,1,32], index: 5, kind: input, shape index: {}]   ;;  %s2800_s6 = inlined_call_operand.vmem [shape: f32[2,1,32], index: 6, kind: input, shape index: {}]   ;;  %s2801_s7 = inlined_call_operand.vmem [shape: f32[2,1,32], index: 7, kind: input, shape index: {}]   ;;  %s2802_s8 = inlined_call_operand.vmem [shape: bf16[2,32,128], index: 8, kind: input, shape index: {}]   ;;  %s2803_s9 = inlined_call_operand.vmem [shape: f32[2,1,128], index: 9, kind: input, shape index: {}]   ;;  %s2804_s10 = inlined_call_operand.vmem [shape: bf16[2,128,32], index: 10, kind: input, shape index: {}]   ;;  %s2805_s11 = inlined_call_operand.vmem [shape: f32[2,1,32], index: 11, kind: input, shape index: {}]   ;;  %s2806_s12 = inlined_call_operand.vmem [shape: f32[2,1,32], index: 12, kind: input, shape index: {}]   ;;  %s2807_s13 = inlined_call_operand.vmem [shape: f32[2,1,32], index: 13, kind: input, shape index: {}]   ;;  %s2808_s14 = inlined_call_operand.hbm [shape: bf16[2,8,32], index: 14, kind: output, shape index: {}]  }
   0x1   :  { %2824 = sst [smem:[#allocation23_spill]] %s2794_s0 }
   0x2   :  { %2825 = sst [smem:[#allocation24_spill]] %s2796_s2 }
   0x3   :  { %2826 = sst [smem:[#allocation25_spill]] %s2798_s4 }
   0x4   :  { %2827 = sst [smem:[#allocation26_spill]] %s2800_s6 }
   0x5   :  { %2828 = sst [smem:[#allocation27_spill]] %s2801_s7 }
   0x6   :  { %2829 = sst [smem:[#allocation28_spill]] %s2802_s8 }
   0x7   :  { %2830 = sst [smem:[#allocation29_spill]] %s2804_s10 }
   0x8   :  { %2831 = sst [smem:[#allocation30_spill]] %s2806_s12 }
   0x9   :  { %2832 = sst [smem:[#allocation31_spill]] %s2807_s13 }
   0xa   :  { %2833 = sst [smem:[#allocation32_spill]] %s2808_s14 }
   0xb   :  { %19 = vsyncpa [#allocation8], 0 }
   0xc   :  { %21 = vsyncpa [#allocation8 + $0x1], 0  ;;  %s2425_s29 = smov 0   ;;  %s2427_s30 = smov 0  }
   0xd   :  { %s2429_s15 = smov 0   ;;  %s2431_s16 = smov 0  }
   0xe   :  { %s2433_s17 = smov 0   ;;  %s2435_s18 = smov 0  }
   0xf   :  { %s2437_s19 = smov 0   ;;  %s2439_s20 = smov 0  }
  0x10 LB: > { %2834 = sst [smem:[#allocation10_spill]] %s2303_s29  ;;  %s1909_s21 = sadd.s32 4294967295, %s2331_s20   ;;  %s2331_s20 = sphi %s2439_s20, %s27_s20   ;;  %s2327_s19 = sphi %s2437_s19, %s2882_s19   ;;  %s2323_s18 = sphi %s2435_s18, %s2881_s18   ;;  %s2319_s17 = sphi %s2433_s17, %s2880_s17   ;;  %s2315_s16 = sphi %s2431_s16, %s2879_s16   ;;  %s2311_s15 = sphi %s2429_s15, %s2878_s15   ;;  %s2307_s30 = sphi %s2427_s30, %s2877_s30   ;;  %s2303_s29 = sphi %s2425_s29, %s2876_s29  }
  0x11   : > { %2835 = sst [smem:[#allocation11_spill]] %s2307_s30  ;;  %s1910_s22 = sadd.s32 4294967294, %s2331_s20  }
  0x12   : > { %2836 = sst [smem:[#allocation12_spill]] %s2311_s15  ;;  %s42_s23 = sadd.s32 1, %s2323_s18 }
  0x13   : > { %2837 = sst [smem:[#allocation13_spill]] %s2315_s16  ;;  %p44_p0 = scmp.ge.s32.totalorder %s42_s23, 2 }
  0x14   : > { %2838 = sst [smem:[#allocation14_spill]] %s2319_s17  ;;  %s46_s24 = sadd.s32 1, %s2327_s19 }
  0x15   : > { %2839 = sst [smem:[#allocation15_spill]] %s2323_s18  ;;  %p433_p1 = scmp.ne.s32.totalorder %s2311_s15, %s2307_s30 }
  0x16   : > { %2840 = sst [smem:[#allocation16_spill]] %s2327_s19  ;;  %p434_p2 = scmp.eq.s32.totalorder %s1909_s21, 3 }
  0x17   : > { %2841 = sst [smem:[#allocation17_spill]] %s2331_s20  ;;  %s2884_s23 = smov (%p44_p0, %s42_s23), 0 }
  0x18   : > { %2842 = sst [smem:[#allocation18_spill]] %s2884_s23  ;;  %s2886_s24 = smov (!%p44_p0, %s46_s24), %s2327_s19 }
  0x19   : > { %p2474_p3 = por %p434_p2, %p433_p1  ;;  %p439_p4 = scmp.ne.s32.totalorder %s2307_s30, %s2303_s29 }
  0x1a   : > { %p48_p5 = scmp.ge.s32.totalorder %s2886_s24, 2  ;;  %p440_p6 = scmp.eq.s32.totalorder %s1910_s22, 3 }
  0x1b   : > { %s2843_s25 = scalar_select %p2474_p3, 1, 0 }
  0x1c   : > { %p1913_p7 = scmp.ge.s32.totalorder %s2331_s20, 1  ;;  %p562_p8 = scmp.lt.s32.totalorder %s2331_s20, 5 }
  0x1d   : > { %2844 = sst [smem:[#allocation19_spill]] %s2843_s25  ;;  %s2888_s24 = smov (%p48_p5, %s2886_s24), 0 }
  0x1e   : > { %2845 = sst [smem:[#allocation20_spill]] %s2888_s24  ;;  %p2484_p9 = por %p440_p6, %p439_p4 }
  0x1f   : > { %p563_p10 = pnand %p1913_p7, %p562_p8  ;;  %s420_s27 = ssub.s32 %s2327_s19, %s2888_s24 }
  0x20   : > { %s2846_s26 = scalar_select %p2484_p9, 1, 0 }
  0x21   : > { %s423_s28 = sadd.s32 1, %s2311_s15  ;;  %p421_p11 = scmp.eq.s32.totalorder %s420_s27, 0 }
  0x22   : > { %2847 = sst [smem:[#allocation21_spill]] %s2846_s26  ;;  %566 = sbr.rel (%p563_p10) target bundleno = 2727 (0xaa7), region = 76 }
  0x23   : > { %s2492_s21 = scalar_select %p421_p11, %s2311_s15, %s423_s28  }
  0x24   : > { %s2811_s22 = sand.u32 (!%p563_p10), 1, %s2307_s30   ;;  %p664_p12 = scmp.lt.s32.totalorder (!%p563_p10), %s2319_s17, 1 }
  0x25   : > { %2848 = sst [smem:[#allocation22_spill]] %s2492_s21  ;;  %s1914_s23 = sshll.u32 (!%p563_p10), %s2811_s22, 2 }
  0x26   : > { %p671_p13 = scmp.lt.s32.totalorder (!%p563_p10), %s2315_s16, 1  ;;  %p727_p0 = scmp.eq.s32.totalorder (!%p563_p10), %s2315_s16, 0 }
  0x27   : > { %s2849_s0 = sld [smem:[#allocation23_spill]] (!%p563_p10)  ;;  %s2850_s2 = sld [smem:[#allocation24_spill]] (!%p563_p10) }
  0x28   : > { %s2851_s4 = sld [smem:[#allocation25_spill]] (!%p563_p10)  ;;  %s2854_s8 = sld [smem:[#allocation28_spill]] (!%p563_p10) }
  0x29   : > { %s2501_s18 = scalar_select %p664_p12, %s2319_s17, 1 }
  0x2a   : > { %s2504_s27 = scalar_select %p671_p13, %s2315_s16, 1 }
  0x2b   : > { %s1915_s28 = sshll.u32 %s2501_s18, 2  ;;  %s2856_s20 = sld [smem:[#allocation30_spill]]  ;;  %vm734_vm0 = vcmask (%p727_p0), 257024  }
  0x2c   : > { %s1970_s29 = sshll.u32 %s2504_s27, 4  ;;  %s706_s16 = scalar_lea.vmem %s2803_s9, %s2504_s27 }
  0x2d   : > { %s667_s26 = scalar_lea.vmem %s2849_s0, %s1915_s28  ;;  %s675_s25 = scalar_lea.vmem %s2850_s2, %s1970_s29 }
  0x2e   : > { %s2525_s10 = scalar_lea.vmem %s2851_s4, %s1970_s29  ;;  %s2542_s17 = scalar_lea.vmem %s2854_s8, %s1970_s29  ;;  %v733_v0 = vld [vmem:[%s667_s26] sm:$0xf] (%p727_p0) }
  0x2f   : > { %s1973_s4 = sshll.u32 %s2504_s27, 6  ;;  %s719_s19 = scalar_lea.vmem %s2805_s11, %s2504_s27 }
  0x30   : > { %s2855_s28 = sld [smem:[#allocation29_spill]]  ;;  %s2857_s8 = sld [smem:[#allocation31_spill]] }
  0x31   : > { %s722_s2 = scalar_lea.vmem %s2856_s20, %s2504_s27  ;;  %s2566_s12 = scalar_lea.vmem [#allocation7], %s1914_s23 }
  0x32   : > { %732 = sbr.rel (!%p727_p0) target bundleno = 57 (0x39), region = 80  ;;  %735 = vst.msk [vmem:[%s2566_s12] sm:$0xf] (%p727_p0), %vm734_vm0, %v733_v0 }
  0x36   : > { %s2556_s6 = scalar_lea.vmem %s2855_s28, %s1973_s4  ;;  %s725_s7 = scalar_lea.vmem %s2857_s8, %s2504_s27 }
  0x39 PF: > { %v2191_v1 = vld [vmem:[%s675_s25] sm:$0xff]   ;;  %v2333_v2 = vmov 0.0   ;;  %v2192_v3 = vld [vmem:[%s675_s25 + $0x8] sm:$0xff]   ;;  %vm2334_vm1 = vmmov 0   ;;  %vm764_vm2 = vcmask 261120   ;;  %s2859_s23 = scalar_lea.vmem %s2797_s3, %s2504_s27  ;;  %vm809_vm3 = vcmask 781312   ;;  %s2860_s14 = scalar_lea.vmem %s2795_s1, %s2501_s18 }
  0x3a   : > { %2012 = vmatprep.subr.bf16.mxu0 %v2333_v2  ;;  %2032 = vmatprep.subr.bf16.mxu1 %v2333_v2  ;;  %v2579_v4 = vld [vmem:[%s2566_s12] sm:$0xf]  ;;  %s2335_s25 = smov 120   ;;  %s2336_s26 = smov 96   ;;  %vm823_vm4 = vcmask 64512   ;;  %vm887_vm5 = vcmask 1043456  }
  0x3b   : > { %2013 = vmatpush3.bf16.msra.mxu0 %v2191_v1  ;;  %2016 = vmatprep.mubr.msk.bf16.mxu0 %vm2334_vm1, %v2333_v2  ;;  %v1925_v5 = vld [vmem:[%s2859_s23] ss:$0 sm:$0xff]  ;;  %s2337_s28 = smov 80   ;;  %s2338_s20 = smov 88   ;;  %vm932_vm6 = vcmask 60416   ;;  %vm1055_vm7 = vcmask 126016  }
  0x3c   : > { %2014 = vmatprep.subr.bf16.mxu0 %v2333_v2  ;;  %2034 = vmatprep.mubr.msk.bf16.mxu1 %vm2334_vm1, %v2333_v2  ;;  %s2339_s24 = smov 72   ;;  %s2340_s22 = smov 112   ;;  %v1929_v28 = vld [vmem:[%s2860_s14] ss:$0 sm:$0xff]  ;;  %vm1178_vm8 = vcmask 191616   ;;  %vm1301_vm9 = vcmask 257216  }
  0x3d   : > { %s2341_s15 = smov 104   ;;  %s2342_s18 = smov 56   ;;  %vm1411_vm12 = vcmask 257024  }
  0x3e   : > { %s2343_s29 = smov 64   ;;  %s2344_s30 = smov 40  }
  0x3f   : > { %2015 = vmatpush3.bf16.msra.mxu0 %v2192_v3  ;;  %s2345_s13 = smov 48   ;;  %s2346_s4 = smov 8  }
  0x40   : > { %2020 = vmatprep.subr.bf16.mxu0 %v2333_v2  ;;  %s2347_s8 = smov 16   ;;  %s2348_s23 = smov 24  }
  0x41   : > { %s2864_s21 = sld [smem:[#allocation27_spill]] }
  0x42   : > { %2017 = vmatmul.mubr.msk.bf16.vlgmr.msra.gmra.mrb[0].mxu0 %vm764_vm2, %v2579_v4 }
  0x43   : > { %2022 = vmatprep.mubr.msk.bf16.mxu0 %vm2334_vm1, %v2333_v2 }
  0x47   : > { %s2865_s0 = scalar_lea.vmem %s2864_s21, %s2504_s27 }
 0x115   : > { %v802_v6 = vpop.f32.mrb[0].mxu0 }
 0x116   : > { %v803_v7 = vadd.f32 %v1925_v5, %v802_v6  ;;  %v2018_v8 = vpop.f32.mrb[1].mxu0 }
 0x117   : > { %v805_v9 = vpop.f32.mrb[2].mxu0 }
 0x118   : > { %v808_v10 = vpack.c.bf16 %v803_v7, %v803_v7  ;;  %v2019_v11 = vpop.f32.mrb[3].mxu0 }
 0x11a   : > { %810 = vst.msk [vmem:[#allocation2] sm:$0xf] %vm809_vm3, %v808_v10 }
 0x121   : > { %v2591_v12 = vld [vmem:[#allocation2] ss:$0 sps:$4 sm:$0xff]  }
 0x122   : > { %v811_v13 = vld [vmem:[#allocation2] sm:$0xf]  ;;  %938 = vrot.lane.b32.xlu1 %v2591_v12, %s2335_s25 }
 0x123   : > { %v2593_v14 = vcombine.low %v811_v13, %v811_v13  ;;  %v2597_v15 = vld [vmem:[#allocation2] ss:$0 sps:$4 sm:$0xff]  }
 0x124   : > { %v2601_v16 = vld [vmem:[#allocation2] ss:$0 sps:$4 sm:$0xff]  }
 0x125   : > { %821 = vrot.lane.b32.xlu0 %v2593_v14, %s2336_s26  ;;  %s2861_s26 = scalar_lea.vmem %s2799_s5, %s2504_s27 }
 0x126   : > { %1063 = vrot.lane.b32.xlu1 %v2597_v15, %s2337_s28 }
 0x129   : > { %940 = vrot.lane.b32.xlu0 %v2591_v12, %s2338_s20  ;;  %s2862_s20 = sld [smem:[#allocation26_spill]] }
 0x12a   : > { %1186 = vrot.lane.b32.xlu1 %v2601_v16, %s2339_s24 }
 0x12d   : > { %1061 = vrot.lane.b32.xlu0 %v2597_v15, %s2340_s22 }
 0x12f   : > { %s2863_s24 = scalar_lea.vmem %s2862_s20, %s2504_s27 }
 0x131   : > { %1184 = vrot.lane.b32.xlu0 %v2601_v16, %s2341_s15  ;;  %s2349_s15 = smov [#allocation7]  }
 0x132   : > { %s2241_s21 = sshll.u32 %s2349_s15, 4  ;;  %s2242_s21 = int_to_ptr.vmem [resolvable:$false] %s2241_s21 }
 0x194   : > { %v939_v19 = vpop.permute.xlu1 %938 }
 0x197   : > { %v822_v17 = vpop.permute.xlu0 %821 }
 0x198   : > { %v828_v18 = vsel %vm823_vm4, %v822_v17, 0  ;;  %v1064_v22 = vpop.permute.xlu1 %1063 }
 0x199   : > { %2021 = vmatpush3.bf16.xpose.msra.mxu0 %v828_v18  ;;  %v1069_v23 = vsel %vm823_vm4, %v1064_v22, 0 }
 0x19a   : > { %2026 = vmatprep.subr.bf16.mxu0 %v2333_v2 }
 0x19b   : > { %v941_v20 = vpop.permute.xlu0 %940 }
 0x19c   : > { %v946_v21 = vsel %vm823_vm4, %v941_v20, 0  ;;  %v1187_v24 = vpop.permute.xlu1 %1186 }
 0x19d   : > { %2033 = vmatpush3.bf16.xpose.msra.mxu1 %v946_v21  ;;  %v1192_v26 = vsel %vm823_vm4, %v1187_v24, 0 }
 0x19e   : > { %2044 = vmatprep.subr.bf16.mxu1 %v2333_v2 }
 0x19f   : > { %v1062_v25 = vpop.permute.xlu0 %1061 }
 0x1a0   : > { %2023 = vmatmul.mubr.msk.bf16.vlgmr.msra.gmra.mrb[4].mxu0 %vm823_vm4, %v811_v13 }
 0x1a1   : > { %2028 = vmatprep.mubr.msk.bf16.mxu0 %vm2334_vm1, %v2333_v2 }
 0x1a3   : > { %v1185_v27 = vpop.permute.xlu0 %1184 }
 0x1a4   : > { %2035 = vmatmul.mubr.msk.bf16.vlgmr.msra.gmra.mrb[0].mxu1 %vm823_vm4, %v939_v19 }
 0x1a5   : > { %2045 = vmatpush3.bf16.xpose.msra.mxu1 %v1069_v23  ;;  %2046 = vmatprep.mubr.msk.bf16.mxu1 %vm2334_vm1, %v2333_v2 }
 0x1a6   : > { %2056 = vmatprep.subr.bf16.mxu1 %v2333_v2 }
 0x1ac   : > { %2047 = vmatmul.mubr.msk.bf16.vlgmr.msra.gmra.mrb[4].mxu1 %vm823_vm4, %v1062_v25 }
 0x1ad   : > { %2057 = vmatpush3.bf16.xpose.msra.mxu1 %v1192_v26  ;;  %2058 = vmatprep.mubr.msk.bf16.mxu1 %vm2334_vm1, %v2333_v2 }
 0x1ae   : > { %2068 = vmatprep.subr.bf16.mxu1 %v2333_v2 }
 0x1b4   : > { %2059 = vmatmul.mubr.msk.bf16.vlgmr.msra.gmra.mrb[8].mxu1 %vm823_vm4, %v1185_v27 }
 0x1b5   : > { %2072 = vmatprep.mubr.msk.bf16.mxu1 %vm2334_vm1, %v2333_v2 }
 0x273   : > { %v864_v29 = vpop.f32.mrb[4].mxu0 }
 0x274   : > { %v865_v30 = vadd.f32 %v1929_v28, %v864_v29  ;;  %v2024_v31 = vpop.f32.mrb[5].mxu0 }
 0x275   : > { %v867_v32 = vpop.f32.mrb[6].mxu0 }
 0x276   : > { %v2025_v33 = vpop.f32.mrb[7].mxu0  ;;  %v870_v34 = vsel %vm823_vm4, %v865_v30, -inf }
 0x277   : > { %v982_v35 = vpop.f32.mrb[0].mxu1  ;;  %871 = vmax.xlane.f32.xlu1 %v870_v34 }
 0x278   : > { %v983_v36 = vadd.f32 %v1929_v28, %v982_v35  ;;  %v2036_v37 = vpop.f32.mrb[1].mxu1 }
 0x279   : > { %v985_v38 = vpop.f32.mrb[2].mxu1 }
 0x27a   : > { %v2037_v39 = vpop.f32.mrb[3].mxu1  ;;  %v988_v40 = vsel %vm823_vm4, %v983_v36, -inf }
 0x27b   : > { %989 = vmax.xlane.f32.xlu0 %v988_v40 }
 0x27f   : > { %v1105_v41 = vpop.f32.mrb[4].mxu1 }
 0x280   : > { %v1106_v42 = vadd.f32 %v1929_v28, %v1105_v41  ;;  %v2048_v43 = vpop.f32.mrb[5].mxu1 }
 0x281   : > { %v1108_v44 = vpop.f32.mrb[6].mxu1 }
 0x282   : > { %v2049_v45 = vpop.f32.mrb[7].mxu1  ;;  %v1111_v46 = vsel %vm823_vm4, %v1106_v42, -inf }
 0x283   : > { %1112 = vmax.xlane.f32.xlu0 %v1111_v46  ;;  %v2197_v45 = vld [vmem:[%s2525_s10] sm:$0xff]  }
 0x284   : > { %2069 = vmatpush3.bf16.msra.mxu1 %v2197_v45 }
 0x285   : > { %2070 = vmatprep.subr.bf16.mxu1 %v2333_v2 }
 0x287   : > { %v1228_v47 = vpop.f32.mrb[8].mxu1 }
 0x288   : > { %v1229_v48 = vadd.f32 %v1929_v28, %v1228_v47  ;;  %v2060_v49 = vpop.f32.mrb[9].mxu1  ;;  %v2198_v47 = vld [vmem:[%s2525_s10 + $0x8] sm:$0xff]  }
 0x289   : > { %v1231_v50 = vpop.f32.mrb[10].mxu1  ;;  %2071 = vmatpush3.bf16.msra.mxu1 %v2198_v47 }
 0x28a   : > { %v2061_v51 = vpop.f32.mrb[11].mxu1  ;;  %v1234_v52 = vsel %vm823_vm4, %v1229_v48, -inf  ;;  %2084 = vmatprep.subr.bf16.mxu1 %v2333_v2 }
 0x28b   : > { %1235 = vmax.xlane.f32.xlu1 %v1234_v52 }
 0x304   : > { %v872_v53 = vpop.xlane.xlu1 %871 }
 0x305   : > { %v873_v54 = vsub.f32 %v865_v30, %v872_v53 }
 0x307   : > { %v874_v55 = vmul.f32 1.442695, %v873_v54 }
 0x308   : > { %v990_v56 = vpop.xlane.xlu0 %989 }
 0x309   : > { %2209 = vpow2.f32 %v874_v55  ;;  %v991_v57 = vsub.f32 %v983_v36, %v990_v56 }
 0x30b   : > { %v992_v58 = vmul.f32 1.442695, %v991_v57 }
 0x30d   : > { %2211 = vpow2.f32 %v992_v58 }
 0x310   : > { %v1113_v59 = vpop.xlane.xlu0 %1112 }
 0x311   : > { %v1114_v60 = vsub.f32 %v1106_v42, %v1113_v59 }
 0x313   : > { %v2210_v61 = vpop.eup %2209  ;;  %v1115_v62 = vmul.f32 1.442695, %v1114_v60 }
 0x314   : > { %v876_v63 = vsel %vm823_vm4, %v2210_v61, 0.0 }
 0x315   : > { %2213 = vpow2.f32 %v1115_v62  ;;  %877 = vadd.xlane.f32.xlu0 %v876_v63  ;;  %v1370_v62 = vunpack.c.l.bf16 %v2579_v4  ;;  %v2200_v4 = vld [vmem:[%s2542_s17 + $0x8] sm:$0xff]  }
 0x317   : > { %v2212_v0 = vpop.eup %2211 }
 0x318   : > { %v994_v1 = vsel %vm823_vm4, %v2212_v0, 0.0  ;;  %v1236_v6 = vpop.xlane.xlu1 %1235 }
 0x319   : > { %995 = vadd.xlane.f32.xlu1 %v994_v1  ;;  %v1237_v7 = vsub.f32 %v1229_v48, %v1236_v6 }
 0x31b   : > { %v1238_v8 = vmul.f32 1.442695, %v1237_v7 }
 0x31d   : > { %2215 = vpow2.f32 %v1238_v8 }
 0x31f   : > { %v2214_v3 = vpop.eup %2213 }
 0x320   : > { %v1117_v5 = vsel %vm823_vm4, %v2214_v3, 0.0 }
 0x321   : > { %1118 = vadd.xlane.f32.xlu0 %v1117_v5 }
 0x327   : > { %v2216_v9 = vpop.eup %2215 }
 0x328   : > { %v1240_v10 = vsel %vm823_vm4, %v2216_v9, 0.0 }
 0x32a   : > { %1000 = vrot.lane.b32.xlu1 %v2591_v12, %s2342_s18 }
 0x337   : > { %882 = vrot.lane.b32.xlu0 %v2593_v14, %s2343_s29  ;;  %s2866_s29 = sld [smem:[#allocation14_spill]] }
 0x33b   : > { %1246 = vrot.lane.b32.xlu0 %v2601_v16, %s2344_s30 }
 0x34e   : > { %1241 = vadd.xlane.f32.xlu1 %v1240_v10 }
 0x35f   : > { %1123 = vrot.lane.b32.xlu1 %v2597_v15, %s2345_s13 }
 0x3a2   : > { %v878_v11 = vpop.xlane.xlu0 %877 }
 0x3a3   : > { %2217 = vrcp.f32 %v878_v11 }
 0x3a6   : > { %v996_v12 = vpop.xlane.xlu1 %995 }
 0x3a7   : > { %2219 = vrcp.f32 %v996_v12 }
 0x3aa   : > { %v1001_v19 = vpop.permute.xlu1 %1000 }
 0x3ab   : > { %v1006_v22 = vsel %vm887_vm5, %v1001_v19, 0 }
 0x3ad   : > { %v2218_v13 = vpop.eup %2217 }
 0x3ae   : > { %v1119_v17 = vpop.xlane.xlu0 %1118  ;;  %v880_v14 = vmul.f32 %v2218_v13, %v2210_v61  ;;  %v1945_v61 = vld [vmem:[%s2861_s26] ss:$0 sm:$0xff]  ;;  %s1967_s26 = sshll.u32 %s2866_s29, 6 }
 0x3af   : > { %2221 = vrcp.f32 %v1119_v17  ;;  %v2199_v13 = vld [vmem:[%s2542_s17] sm:$0xff]   ;;  %s1692_s17 = sshll.u32 %s2566_s12, 4  ;;  %s2739_s17 = int_to_ptr.vmem [resolvable:$true] %s1692_s17 }
 0x3b0   : > { %v881_v20 = vpack.c.bf16 %v880_v14, %v880_v14  ;;  %p2244_p5 = scmp.lt.s32.totalorder %s2739_s17, %s2242_s21 }
 0x3b1   : > { %v2220_v21 = vpop.eup %2219 }
 0x3b2   : > { %v883_v18 = vpop.permute.xlu0 %882  ;;  %v998_v15 = vmul.f32 %v2220_v21, %v2212_v0 }
 0x3b3   : > { %v889_v16 = vsel %vm887_vm5, %v883_v18, 0 }
 0x3b4   : > { %2027 = vmatpush3.bf16.msra.mxu0 %v889_v16  ;;  %v999_v23 = vpack.c.bf16 %v998_v15, %v998_v15 }
 0x3b5   : > { %2038 = vmatprep.subr.bf16.mxu0 %v2333_v2 }
 0x3b6   : > { %v1247_v29 = vpop.permute.xlu0 %1246 }
 0x3b7   : > { %2029 = vmatmul.mubr.msk.bf16.vlgmr.msra.gmra.mrb[8].mxu0 %vm823_vm4, %v881_v20  ;;  %v1252_v31 = vsel %vm887_vm5, %v1247_v29, 0 }
 0x3b8   : > { %2039 = vmatpush3.bf16.msra.mxu0 %v1006_v22  ;;  %2040 = vmatprep.mubr.msk.bf16.mxu0 %vm2334_vm1, %v2333_v2 }
 0x3b9   : > { %2050 = vmatprep.subr.bf16.mxu0 %v2333_v2  ;;  %v2222_v24 = vpop.eup %2221 }
 0x3ba   : > { %v1121_v26 = vmul.f32 %v2222_v24, %v2214_v3 }
 0x3bc   : > { %v1122_v30 = vpack.c.bf16 %v1121_v26, %v1121_v26 }
 0x3bf   : > { %2041 = vmatmul.mubr.msk.bf16.vlgmr.msra.gmra.mrb[12].mxu0 %vm823_vm4, %v999_v23  ;;  %v1949_v23 = vld [vmem:[%s2863_s24] ss:$0 sm:$0xff]  ;;  %s2871_s24 = sld [smem:[#allocation32_spill]] }
 0x3c0   : > { %2052 = vmatprep.mubr.msk.bf16.mxu0 %vm2334_vm1, %v2333_v2 }
 0x3c5   : > { %s2737_s22 = scalar_lea.hbm %s2871_s24, %s1967_s26 }
 0x3db   : > { %v1242_v25 = vpop.xlane.xlu1 %1241 }
 0x3dc   : > { %2223 = vrcp.f32 %v1242_v25  ;;  %v1950_v25 = vld [vmem:[%s2865_s0] ss:$0 sm:$0xff]  ;;  %s2243_s0 = scalar_lea.vmem %s2242_s21, 128 }
 0x3df   : > { %v1124_v27 = vpop.permute.xlu1 %1123 }
 0x3e0   : > { %v1129_v28 = vsel %vm887_vm5, %v1124_v27, 0 }
 0x3e1   : > { %2051 = vmatpush3.bf16.msra.mxu0 %v1129_v28 }
 0x3e2   : > { %2062 = vmatprep.subr.bf16.mxu0 %v2333_v2 }
 0x3e4   : > { %2053 = vmatmul.mubr.msk.bf16.vlgmr.msra.gmra.mrb[16].mxu0 %vm823_vm4, %v1122_v30  ;;  %v2201_v30 = vld [vmem:[%s2556_s6] sm:$0xff]  }
 0x3e5   : > { %2063 = vmatpush3.bf16.msra.mxu0 %v1252_v31  ;;  %2064 = vmatprep.mubr.msk.bf16.mxu0 %vm2334_vm1, %v2333_v2  ;;  %v2202_v31 = vld [vmem:[%s2556_s6 + $0x8] sm:$0xff]  }
 0x3e6   : > { %v2224_v32 = vpop.eup %2223  ;;  %2076 = vmatprep.subr.bf16.mxu0 %v2333_v2 }
 0x3e7   : > { %v1244_v33 = vmul.f32 %v2224_v32, %v2216_v9  ;;  %v2203_v32 = vld [vmem:[%s2556_s6 + $0x10] sm:$0xff]  }
 0x3e9   : > { %v1245_v34 = vpack.c.bf16 %v1244_v33, %v1244_v33  ;;  %v2204_v33 = vld [vmem:[%s2556_s6 + $0x18] sm:$0xff]  }
 0x3ec   : > { %2065 = vmatmul.mubr.msk.bf16.vlgmr.msra.gmra.mrb[20].mxu0 %vm823_vm4, %v1245_v34  ;;  %v2205_v34 = vld [vmem:[%s2556_s6 + $0x20] sm:$0xff]  }
 0x3ed   : > { %2080 = vmatprep.mubr.msk.bf16.mxu0 %vm2334_vm1, %v2333_v2  ;;  %2077 = vmatpush3.bf16.msra.mxu0 %v2199_v13 }
 0x3ee   : > { %2078 = vmatprep.subr.bf16.mxu0 %v2333_v2 }
 0x3f1   : > { %2079 = vmatpush3.bf16.msra.mxu0 %v2200_v4 }
 0x48a   : > { %v925_v35 = vpop.f32.mrb[8].mxu0 }
 0x48b   : > { %v931_v36 = vpack.c.bf16 %v925_v35, %v925_v35  ;;  %v2030_v37 = vpop.f32.mrb[9].mxu0  ;;  %v2206_v35 = vld [vmem:[%s2556_s6 + $0x28] sm:$0xff]  }
 0x48c   : > { %v928_v38 = vpop.f32.mrb[10].mxu0  ;;  %v2208_v37 = vld [vmem:[%s2556_s6 + $0x38] sm:$0xff]  }
 0x48d   : > { %933 = vst.msk [vmem:[#allocation3] sm:$0xf] %vm932_vm6, %v931_v36  ;;  %v2031_v39 = vpop.f32.mrb[11].mxu0  ;;  %v2207_v36 = vld [vmem:[%s2556_s6 + $0x30] sm:$0xff]   ;;  %v1951_v38 = vld [vmem:[%s706_s16] ss:$0 sm:$0xff] }
 0x492   : > { %v1042_v40 = vpop.f32.mrb[12].mxu0 }
 0x493   : > { %v1975_v41 = vpack.c.bf16 %v1042_v40, %v1042_v40  ;;  %v2042_v42 = vpop.f32.mrb[13].mxu0 }
 0x494   : > { %v1045_v43 = vpop.f32.mrb[14].mxu0 }
 0x495   : > { %1052 = vrot.lane.b32.xlu1 %v1975_v41, %s2346_s4  ;;  %v2043_v44 = vpop.f32.mrb[15].mxu0 }
 0x4b7   : > { %v1165_v46 = vpop.f32.mrb[16].mxu0 }
 0x4b8   : > { %v1976_v48 = vpack.c.bf16 %v1165_v46, %v1165_v46  ;;  %v2054_v49 = vpop.f32.mrb[17].mxu0 }
 0x4b9   : > { %v1168_v50 = vpop.f32.mrb[18].mxu0 }
 0x4ba   : > { %1175 = vrot.lane.b32.xlu0 %v1976_v48, %s2347_s8  ;;  %v2055_v51 = vpop.f32.mrb[19].mxu0 }
 0x4bf   : > { %v1288_v52 = vpop.f32.mrb[20].mxu0 }
 0x4c0   : > { %v1977_v53 = vpack.c.bf16 %v1288_v52, %v1288_v52  ;;  %v2066_v54 = vpop.f32.mrb[21].mxu0 }
 0x4c1   : > { %v1291_v55 = vpop.f32.mrb[22].mxu0 }
 0x4c2   : > { %1298 = vrot.lane.b32.xlu1 %v1977_v53, %s2348_s23  ;;  %v2067_v56 = vpop.f32.mrb[23].mxu0 }
 0x507   : > { %v1053_v57 = vpop.permute.xlu1 %1052 }
 0x508   : > { %1056 = vst.msk [vmem:[#allocation3] sm:$0xf] %vm1055_vm7, %v1053_v57 }
 0x52c   : > { %v1176_v58 = vpop.permute.xlu0 %1175 }
 0x52d   : > { %1179 = vst.msk [vmem:[#allocation3] sm:$0xf] %vm1178_vm8, %v1176_v58 }
 0x534   : > { %v1299_v59 = vpop.permute.xlu1 %1298 }
 0x535   : > { %1302 = vst.msk [vmem:[#allocation3] sm:$0xf] %vm1301_vm9, %v1299_v59 }
 0x53c   : > { %v1303_v60 = vld [vmem:[#allocation3] sm:$0xf] }
 0x53d   : > { %2073 = vmatmul.mubr.msk.bf16.vlgmr.msra.gmra.mrb[12].mxu1 %vm764_vm2, %v1303_v60 }
 0x53e   : > { %2100 = vmatprep.mubr.msk.bf16.mxu1 %vm2334_vm1, %v2333_v2  ;;  %2085 = vmatpush3.bf16.msra.mxu1 %v2201_v30  ;;  %v1964_v30 = vld [vmem:[%s722_s2] ss:$0 sm:$0xff] }
 0x53f   : > { %2086 = vmatprep.subr.bf16.mxu1 %v2333_v2 }
 0x542   : > { %2087 = vmatpush3.bf16.msra.mxu1 %v2202_v31 }
 0x543   : > { %2088 = vmatprep.subr.bf16.mxu1 %v2333_v2 }
 0x546   : > { %2089 = vmatpush3.bf16.msra.mxu1 %v2203_v32  ;;  %v1965_v32 = vld [vmem:[%s725_s7] ss:$0 sm:$0xff]  ;;  %s2237_s7 = scalar_lea.vmem %s2739_s17, 64 }
 0x547   : > { %2090 = vmatprep.subr.bf16.mxu1 %v2333_v2  ;;  %p2238_p1 = scmp.ne.s32.totalorder %s2739_s17, %s2237_s7  ;;  %p2245_p6 = scmp.lt.s32.totalorder %s2243_s0, %s2237_s7 }
 0x549   : > { %p2239_p2 = pnand %p2238_p1, %p2474_p3  ;;  %p2246_p7 = por %p2245_p6, %p2244_p5 }
 0x54a   : > { %2091 = vmatpush3.bf16.msra.mxu1 %v2204_v33 }
 0x54b   : > { %2092 = vmatprep.subr.bf16.mxu1 %v2333_v2  ;;  %p2240_p4 = pneg %p2239_p2 }
 0x54d   : > { %p2247_p8 = pnand %p2246_p7, %p2240_p4 }
 0x54e   : > { %2093 = vmatpush3.bf16.msra.mxu1 %v2205_v34 }
 0x54f   : > { %2094 = vmatprep.subr.bf16.mxu1 %v2333_v2 }
 0x552   : > { %2095 = vmatpush3.bf16.msra.mxu1 %v2206_v35 }
 0x553   : > { %2096 = vmatprep.subr.bf16.mxu1 %v2333_v2 }
 0x556   : > { %2097 = vmatpush3.bf16.msra.mxu1 %v2207_v36 }
 0x557   : > { %2098 = vmatprep.subr.bf16.mxu1 %v2333_v2 }
 0x55a   : > { %2099 = vmatpush3.bf16.msra.mxu1 %v2208_v37 }
 0x610   : > { %v1364_v63 = vpop.f32.mrb[12].mxu1 }
 0x611   : > { %v1365_v0 = vadd.f32 %v1945_v61, %v1364_v63  ;;  %v2074_v1 = vpop.f32.mrb[13].mxu1 }
 0x612   : > { %v1367_v3 = vpop.f32.mrb[14].mxu1 }
 0x613   : > { %v2075_v5 = vpop.f32.mrb[15].mxu1  ;;  %v1371_v6 = vadd.f32 %v1370_v62, %v1365_v0 }
 0x615   : > { %v1374_v7 = vsel %vm764_vm2, %v1371_v6, 0.0 }
 0x616   : > { %1375 = vadd.xlane.f32.xlu0 %v1374_v7 }
 0x6a3   : > { %v1376_v8 = vpop.xlane.xlu0 %1375 }
 0x6a4   : > { %v1378_v9 = vmul.f32 0.03125, %v1376_v8 }
 0x6a6   : > { %v1379_v10 = vsub.f32 %v1371_v6, %v1378_v9 }
 0x6a8   : > { %v1380_v11 = vmul.f32 %v1379_v10, %v1379_v10 }
 0x6aa   : > { %v1381_v12 = vsel %vm764_vm2, %v1380_v11, 0.0  ;;  %v1963_v11 = vld [vmem:[%s719_s19] ss:$0 sm:$0xff]  ;;  %s2867_s19 = sld [smem:[#allocation11_spill]] }
 0x6ab   : > { %1382 = vadd.xlane.f32.xlu1 %v1381_v12 }
 0x6b0   : > { %s2872_s2 = sand.u32 1, %s2867_s19  }
 0x6b1   : > { %s1679_s27 = scalar_lea.sflag [#allocation8], %s2872_s2 }
 0x738   : > { %v1383_v17 = vpop.xlane.xlu1 %1382 }
 0x739   : > { %v1384_v14 = vmul.f32 0.032258064, %v1383_v17 }
 0x73b   : > { %2225 = vrsqrt.f32 %v1384_v14  ;;  %vm1387_vm10 = vcmp.eq.f32.partialorder %v1384_v14, inf  ;;  %v1390_v19 = vand.u32 2147483648, %v1384_v14  ;;  %vm1389_vm11 = vcmp.eq.f32.partialorder %v1384_v14, 0.0 }
 0x745   : > { %v2226_v18 = vpop.eup %2225 }
 0x746   : > { %v1386_v16 = vmul.f32 %v2226_v18, %v1384_v14 }
 0x748   : > { %v1388_v20 = vsel %vm1387_vm10, %v1384_v14, %v1386_v16 }
 0x749   : > { %v1391_v21 = vsel %vm1389_vm11, %v1390_v19, %v1388_v20 }
 0x74a   : > { %v1392_v22 = vadd.f32 1e-06, %v1391_v21 }
 0x74c   : > { %2227 = vrcp.f32 %v1392_v22 }
 0x756   : > { %v2228_v15 = vpop.eup %2227 }
 0x757   : > { %v1394_v24 = vmul.f32 %v2228_v15, %v1379_v10 }
 0x759   : > { %v1401_v26 = vmul.f32 %v1949_v23, %v1394_v24 }
 0x75b   : > { %v1408_v27 = vadd.f32 %v1950_v25, %v1401_v26 }
 0x75d   : > { %v1410_v28 = vpack.c.bf16 %v1408_v27, %v1408_v27  ;;  %1409 = vst.msk [vmem:[#allocation4] sm:$0xff] %vm764_vm2, %v1408_v27 }
 0x75f   : > { %1412 = vst.msk [vmem:[#allocation5] sm:$0xf] %vm1411_vm12, %v1410_v28 }
 0x764   : > { %v1636_v4 = vld [vmem:[#allocation4] sm:$0xff] }
 0x766   : > { %v1413_v29 = vld [vmem:[#allocation5] sm:$0xf] }
 0x767   : > { %2081 = vmatmul.mubr.msk.bf16.vlgmr.msra.gmra.mrb[24].mxu0 %vm764_vm2, %v1413_v29 }
 0x83a   : > { %v1475_v39 = vpop.f32.mrb[24].mxu0 }
 0x83b   : > { %v1476_v40 = vadd.f32 %v1951_v38, %v1475_v39  ;;  %v2082_v41 = vpop.f32.mrb[25].mxu0 }
 0x83c   : > { %v1478_v42 = vpop.f32.mrb[26].mxu0 }
 0x83d   : > { %v1482_v43 = vmul.f32 0.70710677, %v1476_v40  ;;  %v2083_v44 = vpop.f32.mrb[27].mxu0  ;;  %v1481_v1 = vmul.f32 0.5, %v1476_v40 }
 0x83f   : > { %v1483_v45 = vand.u32 2147483647, %v1482_v43  ;;  %vm1503_vm13 = vcmp.lt.f32.partialorder %v1482_v43, 0.0 }
 0x841   : > { %v1484_v46 = vmul.f32 0.3275911, %v1483_v45  ;;  %v1497_v48 = vsub.f32 0.0, %v1483_v45 }
 0x843   : > { %v1485_v47 = vadd.f32 1.0, %v1484_v46  ;;  %v1498_v2 = vmul.f32 %v1497_v48, %v1483_v45 }
 0x845   : > { %2229 = vrcp.f32 %v1485_v47  ;;  %v1499_v52 = vmul.f32 1.442695, %v1498_v2 }
 0x847   : > { %2231 = vpow2.f32 %v1499_v52 }
 0x84f   : > { %v2230_v49 = vpop.eup %2229 }
 0x850   : > { %v1488_v50 = vmul.f32 1.0614054, %v2230_v49 }
 0x851   : > { %v2232_v60 = vpop.eup %2231 }
 0x852   : > { %v1489_v51 = vadd.f32 -1.4531521, %v1488_v50 }
 0x854   : > { %v1490_v53 = vmul.f32 %v2230_v49, %v1489_v51 }
 0x856   : > { %v1491_v54 = vadd.f32 1.4214138, %v1490_v53 }
 0x858   : > { %v1492_v55 = vmul.f32 %v2230_v49, %v1491_v54 }
 0x85a   : > { %v1493_v56 = vadd.f32 -0.28449672, %v1492_v55 }
 0x85c   : > { %v1494_v57 = vmul.f32 %v2230_v49, %v1493_v56 }
 0x85e   : > { %v1495_v58 = vadd.f32 0.2548296, %v1494_v57 }
 0x860   : > { %v1496_v59 = vmul.f32 %v2230_v49, %v1495_v58 }
 0x862   : > { %v1501_v61 = vmul.f32 %v2232_v60, %v1496_v59 }
 0x864   : > { %v1502_v62 = vsub.f32 1.0, %v1501_v61 }
 0x866   : > { %v1504_v63 = vsub.f32 0.0, %v1502_v62 }
 0x868   : > { %v1505_v0 = vsel %vm1503_vm13, %v1504_v63, %v1502_v62 }
 0x869   : > { %v1506_v3 = vadd.f32 1.0, %v1505_v0 }
 0x86b   : > { %v1507_v5 = vmul.f32 %v1506_v3, %v1481_v1 }
 0x86d   : > { %v1508_v6 = vpack.c.bf16 %v1507_v5, %v1507_v5 }
 0x86f   : > { %2101 = vmatmul.mubr.bf16.vlgmr.msra.gmra.mrb[16].mxu1 %v1508_v6 }
 0x942   : > { %v1607_v7 = vpop.f32.mrb[16].mxu1 }
 0x943   : > { %1616 = vst.msk [vmem:[#allocation6] sm:$0xff] %vm764_vm2, %v1607_v7  ;;  %v2102_v8 = vpop.f32.mrb[17].mxu1 }
 0x944   : > { %v1610_v9 = vpop.f32.mrb[18].mxu1 }
 0x945   : > { %v2103_v10 = vpop.f32.mrb[19].mxu1 }
 0x94a   : > { %v1627_v12 = vld [vmem:[#allocation6] sm:$0xff] }
 0x94b   : > { %v1635_v13 = vadd.f32 %v1963_v11, %v1627_v12 }
 0x94d   : > { %v1637_v17 = vadd.f32 %v1636_v4, %v1635_v13 }
 0x94f   : > { %v1640_v14 = vsel %vm764_vm2, %v1637_v17, 0.0 }
 0x950   : > { %1641 = vadd.xlane.f32.xlu0 %v1640_v14 }
 0x9dd   : > { %v1642_v18 = vpop.xlane.xlu0 %1641 }
 0x9de   : > { %v1644_v16 = vmul.f32 0.03125, %v1642_v18 }
 0x9e0   : > { %v1645_v19 = vsub.f32 %v1637_v17, %v1644_v16 }
 0x9e2   : > { %v1646_v20 = vmul.f32 %v1645_v19, %v1645_v19 }
 0x9e4   : > { %v1647_v21 = vsel %vm764_vm2, %v1646_v20, 0.0 }
 0x9e5   : > { %1648 = vadd.xlane.f32.xlu0 %v1647_v21 }
 0xa72   : > { %v1649_v22 = vpop.xlane.xlu0 %1648 }
 0xa73   : > { %v1650_v15 = vmul.f32 0.032258064, %v1649_v22 }
 0xa75   : > { %2233 = vrsqrt.f32 %v1650_v15  ;;  %vm1653_vm14 = vcmp.eq.f32.partialorder %v1650_v15, inf  ;;  %v1656_v25 = vand.u32 2147483648, %v1650_v15  ;;  %vm1655_vm15 = vcmp.eq.f32.partialorder %v1650_v15, 0.0 }
 0xa7f   : > { %v2234_v23 = vpop.eup %2233 }
 0xa80   : > { %v1652_v24 = vmul.f32 %v2234_v23, %v1650_v15 }
 0xa82   : > { %v1654_v26 = vsel %vm1653_vm14, %v1650_v15, %v1652_v24 }
 0xa83   : > { %v1657_v27 = vsel %vm1655_vm15, %v1656_v25, %v1654_v26 }
 0xa84   : > { %v1658_v28 = vadd.f32 1e-06, %v1657_v27 }
 0xa86   : > { %2235 = vrcp.f32 %v1658_v28 }
 0xa90   : > { %v2236_v29 = vpop.eup %2235 }
 0xa91   : > { %v1660_v31 = vmul.f32 %v2236_v29, %v1645_v19 }
 0xa93   : > { %v1667_v33 = vmul.f32 %v1964_v30, %v1660_v31 }
 0xa95   : > { %v1674_v34 = vadd.f32 %v1965_v32, %v1667_v33 }
 0xa97   : > { %v1675_v35 = vpack.c.bf16 %v1674_v34, %v1674_v34 }
 0xa99   : > { %1677 = vst.msk [vmem:[%s2566_s12] sm:$0xf] %vm1411_vm12, %v1675_v35 }
 0xa9a   : > { %2250 = shalt.err (!%p2247_p8)
}
 0xa9b   : > { %s2251_s12 = scalar_lea.hbm %s2737_s22, 64  ;;  %s2255_s6 = scalar_lea.hbm %s2871_s24, 128 }
 0xa9c   : > { %p2252_p10 = scmp.ne.s32.totalorder %s2737_s22, %s2251_s12  ;;  %p2256_p13 = scmp.lt.u32.totalorder %s2737_s22, %s2871_s24 }
 0xa9d   : > { %p2257_p0 = scmp.lt.u32.totalorder %s2255_s6, %s2251_s12  ;;  %p2259_p2 = scmp.lt.u32.totalorder %s2251_s12, %s2737_s22 }
 0xa9e   : > { %p2253_p11 = pnand %p2252_p10, %p2474_p3 }
 0xa9f   : > { %p2258_p1 = por %p2257_p0, %p2256_p13 }
 0xaa0   : > { %p2254_p12 = pneg %p2253_p11 }
 0xaa1   : > { %p2260_p4 = por %p2259_p2, %p2258_p1 }
 0xaa3   : > { %p2261_p5 = pnand %p2260_p4, %p2254_p12 }
 0xaa5   : > { %2264 = shalt.err (!%p2261_p5)
}
 0xaa6   : > { %2104 = dma.vmem_to_hbm [thread:$0]  (%p2474_p3), %s2739_s17, 64, %s2737_s22, %s1679_s27  }
 0xaa7 PF: > { %s2873_s19 = sld [smem:[#allocation17_spill]]  ;;  %s2874_s13 = sld [smem:[#allocation10_spill]] }
 0xaad   : > { %p2110_p6 = scmp.ge.s32.totalorder %s2873_s19, 2  ;;  %s1704_s8 = sand.u32 1, %s2874_s13  }
 0xaae   : > { %s1705_s23 = scalar_lea.sflag [#allocation8], %s1704_s8 }
 0xaaf   : > { %p2107_p7 = pnand %p2110_p6, %p2484_p9 }
 0xab1   : > { %2298 = dma.done.wait (!%p2107_p7), %s1705_s23, 64  }
 0xab2   : > { %2300 = vsyncadd (!%p2107_p7), %s1705_s23, 4294967232  ;;  %s27_s20 = sadd.s32 1, %s2873_s19   ;;  %s2876_s29 = sld [smem:[#allocation11_spill]] }
 0xab3   : > { %p24_p8 = scmp.ge.s32.totalorder %s27_s20, 6   ;;  %s2877_s30 = sld [smem:[#allocation12_spill]] }
 0xab4   : > { %s2878_s15 = sld [smem:[#allocation22_spill]]  ;;  %s2879_s16 = sld [smem:[#allocation15_spill]] }
 0xab5   : > { %s2880_s17 = sld [smem:[#allocation16_spill]]  ;;  %s2881_s18 = sld [smem:[#allocation18_spill]] }
 0xab6   : > { %s2882_s19 = sld [smem:[#allocation20_spill]]  ;;  %26 = sbr.rel (!%p24_p8) target bundleno = 16 (0x10), region = 170 }
 0xabd   :  { %1710 = vsyncpa [#allocation8], 1 }
 0xabe   :  { %1712 = vsyncpa [#allocation8 + $0x1], 1 }

</bundles_post_ra>
